<compile_context>
chip_gen: v6e
topology: v6e:2x2x1
jax: 0.10.0
libtpu: 0.0.40
codegen_flags: <defaults>
</compile_context>

<pallas_src>
import math
import jax
import jax.numpy as jnp
from jax import lax
from jax.experimental import pallas as pl
from jax.experimental.pallas import tpu as pltpu


def _round_up(x, m):
    return ((x + m - 1) // m) * m


# ---------------------------------------------------------------------------
# Kernel: one grid step == one RNN layer (weights pipelined across layers)
# ---------------------------------------------------------------------------
def make_fused_rnn_kernel(T, B_pad, D_pad, H_pad, F, chunk_rows, unroll):
    rows = T * B_pad

    def kernel(x_ref, wih_ref, whh_ref, bias_ref, wfc_ref, bfc_ref, o_ref, seq_ref):
        l = pl.program_id(0)
        L = pl.num_programs(0)

        wih = wih_ref[0]        # (F, H_pad)      W_ih^T  (zero-padded rows/cols)
        whh = whh_ref[0]        # (H_pad, H_pad)  W_hh^T
        bias = bias_ref[0]      # (1, H_pad)      b_ih + b_hh

        # ---- hoisted input projection over ALL timesteps, chunked in place ----
        @pl.when(l == 0)
        def _():
            for c0 in range(0, rows, chunk_rows):
                cs = min(chunk_rows, rows - c0)
                seq_ref[pl.ds(c0, cs), :] = (
                    jnp.dot(x_ref[pl.ds(c0, cs), :], wih[:D_pad, :],
                            preferred_element_type=jnp.float32)
                    + bias
                )

        @pl.when(l > 0)
        def _():
            for c0 in range(0, rows, chunk_rows):
                cs = min(chunk_rows, rows - c0)
                chunk = seq_ref[pl.ds(c0, cs), :]          # h_{l-1} rows (value)
                seq_ref[pl.ds(c0, cs), :] = (
                    jnp.dot(chunk, wih[:H_pad, :],
                            preferred_element_type=jnp.float32)
                    + bias
                )

        # ---- serial recurrence: h @ W_hh^T + pre_t, relu per step ----
        def step(t, h_prev):
            start = pl.multiple_of(t * B_pad, B_pad)
            pre_t = seq_ref[pl.ds(start, B_pad), :]        # (B_pad, H_pad)
            h_new = jnp.maximum(
                pre_t + jnp.dot(h_prev, whh, preferred_element_type=jnp.float32),
                0.0,
            )
            seq_ref[pl.ds(start, B_pad), :] = h_new        # next layer's input
            return h_new

        h_last = lax.fori_loop(
            0, T, step, jnp.zeros((B_pad, H_pad), jnp.float32), unroll=unroll
        )

        # ---- fused FC head on the final hidden state of the last layer ----
        @pl.when(l == L - 1)
        def _():
            o_ref[...] = (
                jnp.dot(h_last, wfc_ref[...], preferred_element_type=jnp.float32)
                + bfc_ref[...]
            ).astype(o_ref.dtype)

    return kernel


# ---------------------------------------------------------------------------
# Wrapper
# ---------------------------------------------------------------------------
def rnn_forward(x_btd, params):
    """x_btd: (B, T, D_in) batch_first. Mirrors the PyTorch module's forward."""
    B, T, D_in = x_btd.shape
    layers = params["rnn_layers"]
    L = len(layers)
    H = layers[0][1].shape[0]
    O = params["fc_w"].shape[0]

    B_pad = _round_up(max(B, 8), 8)          # full sublane
    D_pad = _round_up(D_in, 128)             # lane-dense
    H_pad = _round_up(H, 128)
    O_pad = _round_up(O, 128)
    F = max(D_pad, H_pad)                    # uniform W_ih^T row count across layers

    # batch_first -> time-major, pad batch + features, flatten (T, B_pad) rows.
    x = jnp.transpose(x_btd, (1, 0, 2)).astype(jnp.float32)      # (T, B, D_in)
    x = jnp.pad(x, ((0, 0), (0, B_pad - B), (0, D_pad - D_in)))  # (T, B_pad, D_pad)
    x_flat = x.reshape(T * B_pad, D_pad)

    # Stack per-layer weights (zero-padded) so grid=(L,) BlockSpecs pipeline them.
    wih_s, whh_s, bias_s = [], [], []
    for (wih, whh, b_ih, b_hh) in layers:
        d_l = wih.shape[1]
        wih_s.append(jnp.zeros((F, H_pad), jnp.float32).at[:d_l, :H].set(wih.T))
        whh_s.append(jnp.zeros((H_pad, H_pad), jnp.float32).at[:H, :H].set(whh.T))
        bias_s.append(jnp.zeros((1, H_pad), jnp.float32).at[0, :H].set(b_ih + b_hh))
    wih_s = jnp.stack(wih_s)                                     # (L, F, H_pad)
    whh_s = jnp.stack(whh_s)                                     # (L, H_pad, H_pad)
    bias_s = jnp.stack(bias_s)                                   # (L, 1, H_pad)

    wfc = jnp.zeros((H_pad, O_pad), jnp.float32).at[:H, :O].set(params["fc_w"].T)
    bfc = jnp.zeros((1, O_pad), jnp.float32).at[0, :O].set(params["fc_b"])

    # ---- kernel shape/perf parameters ----
    rows = T * B_pad
    chunk_rows = min(rows, max(B_pad, (512 // B_pad) * B_pad))   # multiple of B_pad
    unroll = True if T <= 16 else 8

    # ---- VMEM budget: inputs (conservatively double-buffered) + scratch ----
    f32 = 4
    footprint = (
        2 * rows * D_pad * f32           # x
        + 2 * F * H_pad * f32            # W_ih block (pipelined across layers)
        + 2 * H_pad * H_pad * f32        # W_hh block
        + 2 * 8 * H_pad * f32            # bias block
        + 2 * H_pad * O_pad * f32        # W_fc
        + 2 * 8 * O_pad * f32            # b_fc
        + 2 * B_pad * O_pad * f32        # out
        + rows * H_pad * f32             # seq scratch
    )
    vmem_limit = max(int(footprint * 1.5) + (2 << 20), 16 << 20)
    vmem_limit = min(vmem_limit, 120 << 20)

    kernel = make_fused_rnn_kernel(T, B_pad, D_pad, H_pad, F, chunk_rows, unroll)

    out_pad = pl.pallas_call(
        kernel,
        out_shape=jax.ShapeDtypeStruct((B_pad, O_pad), jnp.float32),
        grid_spec=pltpu.PrefetchScalarGridSpec(
            num_scalar_prefetch=0,
            grid=(L,),
            in_specs=[
                pl.BlockSpec((rows, D_pad), lambda l: (0, 0)),          # x (fetched once)
                pl.BlockSpec((1, F, H_pad), lambda l: (l, 0, 0)),       # W_ih_l^T
                pl.BlockSpec((1, H_pad, H_pad), lambda l: (l, 0, 0)),   # W_hh_l^T
                pl.BlockSpec((1, 1, H_pad), lambda l: (l, 0, 0)),       # bias_l
                pl.BlockSpec((H_pad, O_pad), lambda l: (0, 0)),         # W_fc^T
                pl.BlockSpec((1, O_pad), lambda l: (0, 0)),             # b_fc
            ],
            out_specs=pl.BlockSpec((B_pad, O_pad), lambda l: (0, 0)),
            scratch_shapes=[pltpu.VMEM((rows, H_pad), jnp.float32)],    # seq (persists)
        ),
        compiler_params=pltpu.CompilerParams(
            dimension_semantics=("arbitrary",),   # layers are sequential
            vmem_limit_bytes=vmem_limit,
        ),
    )(x_flat, wih_s, whh_s, bias_s, wfc, bfc)
    return out_pad[:B, :O]


# ---------------------------------------------------------------------------
# Deterministic parameter init (PyTorch-style uniform(-1/sqrt(H), 1/sqrt(H)))
# ---------------------------------------------------------------------------
def init_params(key, input_dim, hidden_dim, layer_dim, output_dim):
    bound = 1.0 / math.sqrt(hidden_dim)
    layers = []
    for l in range(layer_dim):
        d_in = input_dim if l == 0 else hidden_dim
        key, k1, k2, k3, k4 = jax.random.split(key, 5)
        layers.append((
            jax.random.uniform(k1, (hidden_dim, d_in), jnp.float32, -bound, bound),
            jax.random.uniform(k2, (hidden_dim, hidden_dim), jnp.float32, -bound, bound),
            jax.random.uniform(k3, (hidden_dim,), jnp.float32, -bound, bound),
            jax.random.uniform(k4, (hidden_dim,), jnp.float32, -bound, bound),
        ))
    key, k1, k2 = jax.random.split(key, 3)
    fc_w = jax.random.uniform(k1, (output_dim, hidden_dim), jnp.float32, -bound, bound)
    fc_b = jax.random.uniform(k2, (output_dim,), jnp.float32, -bound, bound)
    return {"rnn_layers": layers, "fc_w": fc_w, "fc_b": fc_b}


# ---------------------------------------------------------------------------
# Pure-JAX reference (for correctness check)
# ---------------------------------------------------------------------------
def rnn_forward_ref(x_btd, params):
    B, T, _ = x_btd.shape
    seq = x_btd
    for (wih, whh, b_ih, b_hh) in params["rnn_layers"]:
        H = whh.shape[0]
        h = jnp.zeros((B, H), jnp.float32)
        outs = []
        for t in range(T):
            h = jax.nn.relu(seq[:, t, :] @ wih.T + b_ih + h @ whh.T + b_hh)
            outs.append(h)
        seq = jnp.stack(outs, axis=1)
    return seq[:, -1, :] @ params["fc_w"].T + params["fc_b"]


if __name__ == "__main__":
    B, T = 2, 8
    input_dim, hidden_dim, layer_dim, output_dim = 16, 32, 2, 8

    key = jax.random.PRNGKey(0)
    kx, kp = jax.random.split(key)
    x = jax.random.normal(kx, (B, T, input_dim), jnp.float32)
    params = init_params(kp, input_dim, hidden_dim, layer_dim, output_dim)

    out = rnn_forward(x, params)
    out = jax.block_until_ready(out)

    ref = rnn_forward_ref(x, params)
    assert out.shape == (B, output_dim)
    assert jnp.allclose(out, ref, rtol=1e-4, atol=1e-4), "mismatch vs reference"

    print("KERNEL_OK")
</pallas_src>

<mosaic_0001>
module attributes {stable_mosaic.version = 11 : i64} {
  func.func @kernel(%arg0: i32, %arg1: memref<64x128xf32, #tpu.memory_space<vmem>>, %arg2: memref<1x128x128xf32, #tpu.memory_space<vmem>>, %arg3: memref<1x128x128xf32, #tpu.memory_space<vmem>>, %arg4: memref<1x1x128xf32, #tpu.memory_space<vmem>>, %arg5: memref<128x128xf32, #tpu.memory_space<vmem>>, %arg6: memref<1x128xf32, #tpu.memory_space<vmem>>, %arg7: memref<8x128xf32, #tpu.memory_space<vmem>>, %arg8: memref<64x128xf32, #tpu.memory_space<vmem>>) attributes {dimension_semantics = [#tpu.dimension_semantics<arbitrary>], iteration_bounds = array<i64: 2>, scalar_prefetch = 0 : i64, scratch_operands = 1 : i64, tpu.core_type = #tpu.core_type<tc>, window_params = [{pipeline_mode = #tpu.pipeline_mode<synchronous>, transform_indices = @transform_0, window_bounds = array<i64: 64, 128>}, {transform_indices = @transform_1, window_bounds = array<i64: 1, 128, 128>}, {transform_indices = @transform_2, window_bounds = array<i64: 1, 128, 128>}, {transform_indices = @transform_3, window_bounds = array<i64: 1, 1, 128>}, {pipeline_mode = #tpu.pipeline_mode<synchronous>, transform_indices = @transform_4, window_bounds = array<i64: 128, 128>}, {pipeline_mode = #tpu.pipeline_mode<synchronous>, transform_indices = @transform_5, window_bounds = array<i64: 1, 128>}, {pipeline_mode = #tpu.pipeline_mode<synchronous>, transform_indices = @transform_6, window_bounds = array<i64: 8, 128>}]} {
    %c0 = arith.constant 0 : index
    %c0_0 = arith.constant 0 : index
    %c0_1 = arith.constant 0 : index
    %0 = vector.load %arg2[%c0, %c0_0, %c0_1] : memref<1x128x128xf32, #tpu.memory_space<vmem>>, vector<1x128x128xf32>
    %1 = vector.shape_cast %0 : vector<1x128x128xf32> to vector<128x128xf32>
    %c0_2 = arith.constant 0 : index
    %c0_3 = arith.constant 0 : index
    %c0_4 = arith.constant 0 : index
    %2 = vector.load %arg3[%c0_2, %c0_3, %c0_4] : memref<1x128x128xf32, #tpu.memory_space<vmem>>, vector<1x128x128xf32>
    %3 = vector.shape_cast %2 : vector<1x128x128xf32> to vector<128x128xf32>
    %c0_5 = arith.constant 0 : index
    %c0_6 = arith.constant 0 : index
    %c0_7 = arith.constant 0 : index
    %4 = vector.load %arg4[%c0_5, %c0_6, %c0_7] : memref<1x1x128xf32, #tpu.memory_space<vmem>>, vector<1x1x128xf32>
    %5 = vector.shape_cast %4 : vector<1x1x128xf32> to vector<1x128xf32>
    %c0_i32 = arith.constant 0 : i32
    %6 = arith.cmpi eq, %arg0, %c0_i32 : i32
    %7 = arith.extui %6 : i1 to i32
    %c0_i32_8 = arith.constant 0 : i32
    %8 = arith.cmpi ne, %7, %c0_i32_8 : i32
    scf.if %8 {
      %c0_54 = arith.constant 0 : index
      %c0_55 = arith.constant 0 : index
      %96 = vector.load %arg1[%c0_54, %c0_55] : memref<64x128xf32, #tpu.memory_space<vmem>>, vector<64x128xf32>
      %cst_56 = arith.constant dense<0.000000e+00> : vector<64x128xf32>
      %97 = tpu.matmul %96, %1, %cst_56 {dimension_numbers = #tpu.dot_dimension_numbers<[1], [0], [0], [1], [0, 0, 1, 1], [], []>} : vector<64x128xf32>, vector<128x128xf32>, vector<64x128xf32> -> vector<64x128xf32>
      %98 = vector.broadcast %5 : vector<1x128xf32> to vector<64x128xf32>
      %99 = arith.addf %97, %98 : vector<64x128xf32>
      %c0_57 = arith.constant 0 : index
      %c0_58 = arith.constant 0 : index
      %100 = vector.load %arg8[%c0_57, %c0_58] : memref<64x128xf32, #tpu.memory_space<vmem>>, vector<64x128xf32>
      tpu.vector_store %arg8[%c0_57, %c0_58], %99 {strides = array<i32>} : memref<64x128xf32, #tpu.memory_space<vmem>>, vector<64x128xf32>,
    } else {
    }
    %c0_i32_9 = arith.constant 0 : i32
    %9 = arith.cmpi sgt, %arg0, %c0_i32_9 : i32
    %10 = arith.extui %9 : i1 to i32
    %c0_i32_10 = arith.constant 0 : i32
    %11 = arith.cmpi ne, %10, %c0_i32_10 : i32
    scf.if %11 {
      %c0_54 = arith.constant 0 : index
      %c0_55 = arith.constant 0 : index
      %96 = vector.load %arg8[%c0_54, %c0_55] : memref<64x128xf32, #tpu.memory_space<vmem>>, vector<64x128xf32>
      %cst_56 = arith.constant dense<0.000000e+00> : vector<64x128xf32>
      %97 = tpu.matmul %96, %1, %cst_56 {dimension_numbers = #tpu.dot_dimension_numbers<[1], [0], [0], [1], [0, 0, 1, 1], [], []>} : vector<64x128xf32>, vector<128x128xf32>, vector<64x128xf32> -> vector<64x128xf32>
      %98 = vector.broadcast %5 : vector<1x128xf32> to vector<64x128xf32>
      %99 = arith.addf %97, %98 : vector<64x128xf32>
      %c0_57 = arith.constant 0 : index
      %c0_58 = arith.constant 0 : index
      %100 = vector.load %arg8[%c0_57, %c0_58] : memref<64x128xf32, #tpu.memory_space<vmem>>, vector<64x128xf32>
      tpu.vector_store %arg8[%c0_57, %c0_58], %99 {strides = array<i32>} : memref<64x128xf32, #tpu.memory_space<vmem>>, vector<64x128xf32>,
    } else {
    }
    %cst = arith.constant 0.000000e+00 : f32
    %12 = vector.broadcast %cst : f32 to vector<8x128xf32>
    %c0_i32_11 = arith.constant 0 : i32
    %c8_i32 = arith.constant 8 : i32
    %13 = arith.muli %c0_i32_11, %c8_i32 : i32
    %14 = tpu.assume_multiple %13, 8 : i32
    %15 = arith.index_cast %14 : i32 to index
    %c0_12 = arith.constant 0 : index
    %16 = vector.load %arg8[%15, %c0_12] : memref<64x128xf32, #tpu.memory_space<vmem>>, vector<8x128xf32>
    %cst_13 = arith.constant dense<0.000000e+00> : vector<8x128xf32>
    %17 = tpu.matmul %12, %3, %cst_13 {dimension_numbers = #tpu.dot_dimension_numbers<[1], [0], [0], [1], [0, 0, 1, 1], [], []>} : vector<8x128xf32>, vector<128x128xf32>, vector<8x128xf32> -> vector<8x128xf32>
    %18 = arith.addf %16, %17 : vector<8x128xf32>
    %cst_14 = arith.constant 0.000000e+00 : f32
    %19 = vector.broadcast %cst_14 : f32 to vector<8x128xf32>
    %20 = arith.maximumf %18, %19 : vector<8x128xf32>
    %21 = arith.index_cast %14 : i32 to index
    %c0_15 = arith.constant 0 : index
    %22 = vector.load %arg8[%21, %c0_15] : memref<64x128xf32, #tpu.memory_space<vmem>>, vector<8x128xf32>
    tpu.vector_store %arg8[%21, %c0_15], %20 {strides = array<i32>} : memref<64x128xf32, #tpu.memory_space<vmem>>, vector<8x128xf32>,
    %c1_i32 = arith.constant 1 : i32
    %c8_i32_16 = arith.constant 8 : i32
    %23 = arith.muli %c1_i32, %c8_i32_16 : i32
    %24 = tpu.assume_multiple %23, 8 : i32
    %25 = arith.index_cast %24 : i32 to index
    %c0_17 = arith.constant 0 : index
    %26 = vector.load %arg8[%25, %c0_17] : memref<64x128xf32, #tpu.memory_space<vmem>>, vector<8x128xf32>
    %cst_18 = arith.constant dense<0.000000e+00> : vector<8x128xf32>
    %27 = tpu.matmul %20, %3, %cst_18 {dimension_numbers = #tpu.dot_dimension_numbers<[1], [0], [0], [1], [0, 0, 1, 1], [], []>} : vector<8x128xf32>, vector<128x128xf32>, vector<8x128xf32> -> vector<8x128xf32>
    %28 = arith.addf %26, %27 : vector<8x128xf32>
    %cst_19 = arith.constant 0.000000e+00 : f32
    %29 = vector.broadcast %cst_19 : f32 to vector<8x128xf32>
    %30 = arith.maximumf %28, %29 : vector<8x128xf32>
    %31 = arith.index_cast %24 : i32 to index
    %c0_20 = arith.constant 0 : index
    %32 = vector.load %arg8[%31, %c0_20] : memref<64x128xf32, #tpu.memory_space<vmem>>, vector<8x128xf32>
    tpu.vector_store %arg8[%31, %c0_20], %30 {strides = array<i32>} : memref<64x128xf32, #tpu.memory_space<vmem>>, vector<8x128xf32>,
    %c2_i32 = arith.constant 2 : i32
    %c8_i32_21 = arith.constant 8 : i32
    %33 = arith.muli %c2_i32, %c8_i32_21 : i32
    %34 = tpu.assume_multiple %33, 8 : i32
    %35 = arith.index_cast %34 : i32 to index
    %c0_22 = arith.constant 0 : index
    %36 = vector.load %arg8[%35, %c0_22] : memref<64x128xf32, #tpu.memory_space<vmem>>, vector<8x128xf32>
    %cst_23 = arith.constant dense<0.000000e+00> : vector<8x128xf32>
    %37 = tpu.matmul %30, %3, %cst_23 {dimension_numbers = #tpu.dot_dimension_numbers<[1], [0], [0], [1], [0, 0, 1, 1], [], []>} : vector<8x128xf32>, vector<128x128xf32>, vector<8x128xf32> -> vector<8x128xf32>
    %38 = arith.addf %36, %37 : vector<8x128xf32>
    %cst_24 = arith.constant 0.000000e+00 : f32
    %39 = vector.broadcast %cst_24 : f32 to vector<8x128xf32>
    %40 = arith.maximumf %38, %39 : vector<8x128xf32>
    %41 = arith.index_cast %34 : i32 to index
    %c0_25 = arith.constant 0 : index
    %42 = vector.load %arg8[%41, %c0_25] : memref<64x128xf32, #tpu.memory_space<vmem>>, vector<8x128xf32>
    tpu.vector_store %arg8[%41, %c0_25], %40 {strides = array<i32>} : memref<64x128xf32, #tpu.memory_space<vmem>>, vector<8x128xf32>,
    %c3_i32 = arith.constant 3 : i32
    %c8_i32_26 = arith.constant 8 : i32
    %43 = arith.muli %c3_i32, %c8_i32_26 : i32
    %44 = tpu.assume_multiple %43, 8 : i32
    %45 = arith.index_cast %44 : i32 to index
    %c0_27 = arith.constant 0 : index
    %46 = vector.load %arg8[%45, %c0_27] : memref<64x128xf32, #tpu.memory_space<vmem>>, vector<8x128xf32>
    %cst_28 = arith.constant dense<0.000000e+00> : vector<8x128xf32>
    %47 = tpu.matmul %40, %3, %cst_28 {dimension_numbers = #tpu.dot_dimension_numbers<[1], [0], [0], [1], [0, 0, 1, 1], [], []>} : vector<8x128xf32>, vector<128x128xf32>, vector<8x128xf32> -> vector<8x128xf32>
    %48 = arith.addf %46, %47 : vector<8x128xf32>
    %cst_29 = arith.constant 0.000000e+00 : f32
    %49 = vector.broadcast %cst_29 : f32 to vector<8x128xf32>
    %50 = arith.maximumf %48, %49 : vector<8x128xf32>
    %51 = arith.index_cast %44 : i32 to index
    %c0_30 = arith.constant 0 : index
    %52 = vector.load %arg8[%51, %c0_30] : memref<64x128xf32, #tpu.memory_space<vmem>>, vector<8x128xf32>
    tpu.vector_store %arg8[%51, %c0_30], %50 {strides = array<i32>} : memref<64x128xf32, #tpu.memory_space<vmem>>, vector<8x128xf32>,
    %c4_i32 = arith.constant 4 : i32
    %c8_i32_31 = arith.constant 8 : i32
    %53 = arith.muli %c4_i32, %c8_i32_31 : i32
    %54 = tpu.assume_multiple %53, 8 : i32
    %55 = arith.index_cast %54 : i32 to index
    %c0_32 = arith.constant 0 : index
    %56 = vector.load %arg8[%55, %c0_32] : memref<64x128xf32, #tpu.memory_space<vmem>>, vector<8x128xf32>
    %cst_33 = arith.constant dense<0.000000e+00> : vector<8x128xf32>
    %57 = tpu.matmul %50, %3, %cst_33 {dimension_numbers = #tpu.dot_dimension_numbers<[1], [0], [0], [1], [0, 0, 1, 1], [], []>} : vector<8x128xf32>, vector<128x128xf32>, vector<8x128xf32> -> vector<8x128xf32>
    %58 = arith.addf %56, %57 : vector<8x128xf32>
    %cst_34 = arith.constant 0.000000e+00 : f32
    %59 = vector.broadcast %cst_34 : f32 to vector<8x128xf32>
    %60 = arith.maximumf %58, %59 : vector<8x128xf32>
    %61 = arith.index_cast %54 : i32 to index
    %c0_35 = arith.constant 0 : index
    %62 = vector.load %arg8[%61, %c0_35] : memref<64x128xf32, #tpu.memory_space<vmem>>, vector<8x128xf32>
    tpu.vector_store %arg8[%61, %c0_35], %60 {strides = array<i32>} : memref<64x128xf32, #tpu.memory_space<vmem>>, vector<8x128xf32>,
    %c5_i32 = arith.constant 5 : i32
    %c8_i32_36 = arith.constant 8 : i32
    %63 = arith.muli %c5_i32, %c8_i32_36 : i32
    %64 = tpu.assume_multiple %63, 8 : i32
    %65 = arith.index_cast %64 : i32 to index
    %c0_37 = arith.constant 0 : index
    %66 = vector.load %arg8[%65, %c0_37] : memref<64x128xf32, #tpu.memory_space<vmem>>, vector<8x128xf32>
    %cst_38 = arith.constant dense<0.000000e+00> : vector<8x128xf32>
    %67 = tpu.matmul %60, %3, %cst_38 {dimension_numbers = #tpu.dot_dimension_numbers<[1], [0], [0], [1], [0, 0, 1, 1], [], []>} : vector<8x128xf32>, vector<128x128xf32>, vector<8x128xf32> -> vector<8x128xf32>
    %68 = arith.addf %66, %67 : vector<8x128xf32>
    %cst_39 = arith.constant 0.000000e+00 : f32
    %69 = vector.broadcast %cst_39 : f32 to vector<8x128xf32>
    %70 = arith.maximumf %68, %69 : vector<8x128xf32>
    %71 = arith.index_cast %64 : i32 to index
    %c0_40 = arith.constant 0 : index
    %72 = vector.load %arg8[%71, %c0_40] : memref<64x128xf32, #tpu.memory_space<vmem>>, vector<8x128xf32>
    tpu.vector_store %arg8[%71, %c0_40], %70 {strides = array<i32>} : memref<64x128xf32, #tpu.memory_space<vmem>>, vector<8x128xf32>,
    %c6_i32 = arith.constant 6 : i32
    %c8_i32_41 = arith.constant 8 : i32
    %73 = arith.muli %c6_i32, %c8_i32_41 : i32
    %74 = tpu.assume_multiple %73, 8 : i32
    %75 = arith.index_cast %74 : i32 to index
    %c0_42 = arith.constant 0 : index
    %76 = vector.load %arg8[%75, %c0_42] : memref<64x128xf32, #tpu.memory_space<vmem>>, vector<8x128xf32>
    %cst_43 = arith.constant dense<0.000000e+00> : vector<8x128xf32>
    %77 = tpu.matmul %70, %3, %cst_43 {dimension_numbers = #tpu.dot_dimension_numbers<[1], [0], [0], [1], [0, 0, 1, 1], [], []>} : vector<8x128xf32>, vector<128x128xf32>, vector<8x128xf32> -> vector<8x128xf32>
    %78 = arith.addf %76, %77 : vector<8x128xf32>
    %cst_44 = arith.constant 0.000000e+00 : f32
    %79 = vector.broadcast %cst_44 : f32 to vector<8x128xf32>
    %80 = arith.maximumf %78, %79 : vector<8x128xf32>
    %81 = arith.index_cast %74 : i32 to index
    %c0_45 = arith.constant 0 : index
    %82 = vector.load %arg8[%81, %c0_45] : memref<64x128xf32, #tpu.memory_space<vmem>>, vector<8x128xf32>
    tpu.vector_store %arg8[%81, %c0_45], %80 {strides = array<i32>} : memref<64x128xf32, #tpu.memory_space<vmem>>, vector<8x128xf32>,
    %c7_i32 = arith.constant 7 : i32
    %c8_i32_46 = arith.constant 8 : i32
    %83 = arith.muli %c7_i32, %c8_i32_46 : i32
    %84 = tpu.assume_multiple %83, 8 : i32
    %85 = arith.index_cast %84 : i32 to index
    %c0_47 = arith.constant 0 : index
    %86 = vector.load %arg8[%85, %c0_47] : memref<64x128xf32, #tpu.memory_space<vmem>>, vector<8x128xf32>
    %cst_48 = arith.constant dense<0.000000e+00> : vector<8x128xf32>
    %87 = tpu.matmul %80, %3, %cst_48 {dimension_numbers = #tpu.dot_dimension_numbers<[1], [0], [0], [1], [0, 0, 1, 1], [], []>} : vector<8x128xf32>, vector<128x128xf32>, vector<8x128xf32> -> vector<8x128xf32>
    %88 = arith.addf %86, %87 : vector<8x128xf32>
    %cst_49 = arith.constant 0.000000e+00 : f32
    %89 = vector.broadcast %cst_49 : f32 to vector<8x128xf32>
    %90 = arith.maximumf %88, %89 : vector<8x128xf32>
    %91 = arith.index_cast %84 : i32 to index
    %c0_50 = arith.constant 0 : index
    %92 = vector.load %arg8[%91, %c0_50] : memref<64x128xf32, #tpu.memory_space<vmem>>, vector<8x128xf32>
    tpu.vector_store %arg8[%91, %c0_50], %90 {strides = array<i32>} : memref<64x128xf32, #tpu.memory_space<vmem>>, vector<8x128xf32>,
    %c8_i32_51 = arith.constant 8 : i32
    %c1_i32_52 = arith.constant 1 : i32
    %93 = arith.cmpi eq, %arg0, %c1_i32_52 : i32
    %94 = arith.extui %93 : i1 to i32
    %c0_i32_53 = arith.constant 0 : i32
    %95 = arith.cmpi ne, %94, %c0_i32_53 : i32
    scf.if %95 {
      %c0_54 = arith.constant 0 : index
      %c0_55 = arith.constant 0 : index
      %96 = vector.load %arg5[%c0_54, %c0_55] : memref<128x128xf32, #tpu.memory_space<vmem>>, vector<128x128xf32>
      %cst_56 = arith.constant dense<0.000000e+00> : vector<8x128xf32>
      %97 = tpu.matmul %90, %96, %cst_56 {dimension_numbers = #tpu.dot_dimension_numbers<[1], [0], [0], [1], [0, 0, 1, 1], [], []>} : vector<8x128xf32>, vector<128x128xf32>, vector<8x128xf32> -> vector<8x128xf32>
      %c0_57 = arith.constant 0 : index
      %c0_58 = arith.constant 0 : index
      %98 = vector.load %arg6[%c0_57, %c0_58] : memref<1x128xf32, #tpu.memory_space<vmem>>, vector<1x128xf32>
      %99 = vector.broadcast %98 : vector<1x128xf32> to vector<8x128xf32>
      %100 = arith.addf %97, %99 : vector<8x128xf32>
      %c0_59 = arith.constant 0 : index
      %c0_60 = arith.constant 0 : index
      %101 = vector.load %arg7[%c0_59, %c0_60] : memref<8x128xf32, #tpu.memory_space<vmem>>, vector<8x128xf32>
      tpu.vector_store %arg7[%c0_59, %c0_60], %100 {strides = array<i32>} : memref<8x128xf32, #tpu.memory_space<vmem>>, vector<8x128xf32>,
    } else {
    }
    return
  }
  func.func @transform_0(%arg0: i32) -> (i32, i32) {
    %c0_i32 = arith.constant 0 : i32
    %c0_i32_0 = arith.constant 0 : i32
    %c0_i32_1 = arith.constant 0 : i32
    return %c0_i32, %c0_i32_0 : i32, i32
  }
  func.func @transform_1(%arg0: i32) -> (i32, i32, i32) {
    %c0_i32 = arith.constant 0 : i32
    %c0_i32_0 = arith.constant 0 : i32
    %c0_i32_1 = arith.constant 0 : i32
    return %arg0, %c0_i32, %c0_i32_0 : i32, i32, i32
  }
  func.func @transform_2(%arg0: i32) -> (i32, i32, i32) {
    %c0_i32 = arith.constant 0 : i32
    %c0_i32_0 = arith.constant 0 : i32
    %c0_i32_1 = arith.constant 0 : i32
    return %arg0, %c0_i32, %c0_i32_0 : i32, i32, i32
  }
  func.func @transform_3(%arg0: i32) -> (i32, i32, i32) {
    %c0_i32 = arith.constant 0 : i32
    %c0_i32_0 = arith.constant 0 : i32
    %c0_i32_1 = arith.constant 0 : i32
    return %arg0, %c0_i32, %c0_i32_0 : i32, i32, i32
  }
  func.func @transform_4(%arg0: i32) -> (i32, i32) {
    %c0_i32 = arith.constant 0 : i32
    %c0_i32_0 = arith.constant 0 : i32
    %c0_i32_1 = arith.constant 0 : i32
    return %c0_i32, %c0_i32_0 : i32, i32
  }
  func.func @transform_5(%arg0: i32) -> (i32, i32) {
    %c0_i32 = arith.constant 0 : i32
    %c0_i32_0 = arith.constant 0 : i32
    %c0_i32_1 = arith.constant 0 : i32
    return %c0_i32, %c0_i32_0 : i32, i32
  }
  func.func @transform_6(%arg0: i32) -> (i32, i32) {
    %c0_i32 = arith.constant 0 : i32
    %c0_i32_0 = arith.constant 0 : i32
    %c0_i32_1 = arith.constant 0 : i32
    return %c0_i32, %c0_i32_0 : i32, i32
  }
}

</mosaic_0001>

<bundles_post_ra>
// kernel: tpu_custom_call.1
= control target key start
LH: loop header
LB: loop body
LE: loop exit
PB: predicated region body
PF: predicated region fallthrough
CT: control target
= control target key end

     0   :  { %11 = vsyncpa [#allocation4], 0  ;;  %s3160_s0 = inlined_call_operand.hbm [shape: f32[64,128], index: 0, kind: input, shape index: {}]   ;;  %s3161_s1 = inlined_call_operand.hbm [shape: f32[2,128,128], index: 1, kind: input, shape index: {}]   ;;  %s3162_s2 = inlined_call_operand.hbm [shape: f32[2,128,128], index: 2, kind: input, shape index: {}]   ;;  %s3163_s3 = inlined_call_operand.vmem [shape: f32[2,1,128], index: 3, kind: input, shape index: {}]   ;;  %s3164_s4 = inlined_call_operand.hbm [shape: f32[128,128], index: 4, kind: input, shape index: {}]   ;;  %s3165_s5 = inlined_call_operand.vmem [shape: f32[1,128], index: 5, kind: input, shape index: {}]   ;;  %s3166_s6 = inlined_call_operand.hbm [shape: f32[8,128], index: 6, kind: output, shape index: {}]  }
   0x1   :  { %12 = vsyncpa [#allocation7], 0 }
   0x2   :  { %14 = vsyncpa [#allocation7 + $0x1], 0 }
   0x3   :  { %15 = vsyncpa [#allocation10], 0 }
   0x4   :  { %16 = vsyncpa [#allocation5], 0  ;;  %s2437_s21 = smov 0   ;;  %s2439_s22 = smov 0  }
   0x5   :  { %s2441_s23 = smov 0   ;;  %s2443_s24 = smov 0  }
   0x6 LB: > { %s2458_s25 = sadd.s32 1, %s2389_s24   ;;  %s50_s26 = sadd.s32 1, %s2385_s23  ;;  %s2389_s24 = sphi %s2443_s24, %s3184_s24   ;;  %s2385_s23 = sphi %s2441_s23, %s3183_s23   ;;  %s2381_s22 = sphi %s2439_s22, %s3182_s22   ;;  %s2377_s21 = sphi %s2437_s21, %s3181_s21  }
   0x7   : > { %s47_s27 = ssub.s32 %s2389_s24, %s2458_s25  ;;  %p57_p0 = scmp.ne.s32.totalorder %s2385_s23, %s2381_s22 }
   0x8   : > { %p48_p1 = scmp.eq.s32.totalorder %s47_s27, 0  ;;  %p58_p2 = scmp.eq.s32.totalorder %s2389_s24, 0 }
   0x9   : > { %p2165_p4 = scmp.lt.s32.totalorder %s2389_s24, 2  ;;  %s231_s29 = sand.u32 1, %s2389_s24  }
   0xa   : > { %s2467_s28 = scalar_select %p48_p1, %s2385_s23, %s50_s26  }
   0xb   : > { %p59_p3 = por %p58_p2, %p57_p0  ;;  %s233_s30 = sand.u32 1, %s2385_s23  }
   0xc   : > { %s2472_s7 = sshll.u32 %s233_s30, 7  ;;  %s1463_s8 = sshll.u32 %s2389_s24, 11 }
   0xd   : > { %s2480_s11 = scalar_lea.hbm %s3161_s1, %s1463_s8  ;;  %s235_s12 = scalar_lea.vmem [#allocation6], %s2472_s7 }
   0xe   : > { %s242_s13 = sshll.u32 %s235_s12, 4  ;;  %p2483_p5 = pnand %p2165_p4, %p59_p3  ;;  %s2487_s13 = int_to_ptr.vmem [resolvable:$true] %s242_s13 }
   0xf   : > { %s2489_s15 = scalar_lea.sflag [#allocation7], %s231_s29  ;;  %s2211_s16 = scalar_lea.hbm %s2480_s11, 2048 }
  0x10   : > { %p2212_p6 = scmp.ne.s32.totalorder %s2480_s11, %s2211_s16  ;;  %p2213_p7 = pneg %p2483_p5 }
  0x11   : > { %s2216_s19 = scalar_lea.hbm %s3161_s1, 4096  ;;  %p2217_p10 = scmp.lt.s32.totalorder %s2480_s11, %s3161_s1 }
  0x12   : > { %p2214_p8 = pnand %p2213_p7, %p2212_p6  ;;  %p2218_p11 = scmp.lt.s32.totalorder %s2216_s19, %s2211_s16 }
  0x14   : > { %p2215_p9 = pneg %p2214_p8  ;;  %p2219_p12 = por %p2218_p11, %p2217_p10 }
  0x16   : > { %p2220_p13 = pnand %p2219_p12, %p2215_p9 }
  0x18   : > { %2223 = shalt.err (!%p2220_p13)
}
  0x19   : > { %s2224_s27 = scalar_lea.vmem %s2487_s13, 2048  ;;  %s2391_s29 = smov [#allocation6]  }
  0x1a   : > { %p2225_p0 = scmp.ne.s32.totalorder %s2487_s13, %s2224_s27  ;;  %s2229_s30 = sshll.u32 %s2391_s29, 4  ;;  %s2230_s30 = int_to_ptr.vmem [resolvable:$false] %s2229_s30 }
  0x1b   : > { %s2231_s9 = scalar_lea.vmem %s2230_s30, 4096  ;;  %p2232_p3 = scmp.lt.s32.totalorder %s2487_s13, %s2230_s30 }
  0x1c   : > { %p2227_p1 = pnand %p2225_p0, %p2213_p7  ;;  %p2233_p4 = scmp.lt.s32.totalorder %s2231_s9, %s2224_s27 }
  0x1e   : > { %p2228_p2 = pneg %p2227_p1  ;;  %p2234_p6 = por %p2233_p4, %p2232_p3 }
  0x20   : > { %p2235_p8 = pnand %p2234_p6, %p2228_p2 }
  0x22   : > { %2238 = shalt.err (!%p2235_p8)
}
  0x23   : > { %s2392_s10 = smov 128   ;;  %s2393_s12 = smov 8  }
  0x24   : > { %2159 = dma.hbm_to_vmem [thread:$0]  (!%p2483_p5), %s2480_s11, 2048, %s2487_s13, %s2489_s15, %s2392_s10, %s2392_s10, %s2393_s12  }
  0x25   : > { %s2524_s18 = scalar_lea.hbm %s3162_s2, %s1463_s8  ;;  %s256_s19 = scalar_lea.vmem [#allocation8], %s2472_s7 }
  0x26   : > { %s263_s20 = sshll.u32 %s256_s19, 4  ;;  %s2528_s26 = sadd.s32 4294967295, %s2389_s24   ;;  %s2546_s20 = int_to_ptr.vmem [resolvable:$true] %s263_s20 }
  0x27   : > { %p63_p9 = scmp.ne.s32.totalorder %s2381_s22, %s2377_s21  ;;  %p3167_p10 = scmp.eq.s32.totalorder %s2528_s26, 0 }
  0x28   : > { %p1440_p11 = scmp.ge.s32.totalorder %s2389_s24, 1  ;;  %p189_p12 = scmp.lt.s32.totalorder %s2389_s24, 3 }
  0x29   : > { %p2538_p0 = por %p3167_p10, %p63_p9  ;;  %s2394_s11 = smov [#allocation3]  }
  0x2a   : > { %p2542_p1 = pnand %p1440_p11, %p189_p12  ;;  %s201_s21 = sshll.u32 %s2394_s11, 4  ;;  %s2550_s21 = int_to_ptr.vmem [resolvable:$true] %s201_s21 }
  0x2b   : > { %s3171_s8 = scalar_select %p2538_p0, 1, 0 }
  0x2c   : > { %s3172_s7 = scalar_select %p2542_p1, 1, 0 }
  0x2d   : > { %p2149_p2 = pneg %p2542_p1  ;;  %s2395_s13 = smov [#allocation9]  }
  0x2e   : > { %s214_s24 = sshll.u32 %s2395_s13, 4  ;;  %s2239_s29 = scalar_lea.hbm %s2524_s18, 2048  ;;  %s2558_s24 = int_to_ptr.vmem [resolvable:$true] %s214_s24 }
  0x2f   : > { %p2554_p3 = pnand %p2149_p2, %p3167_p10  ;;  %p2240_p4 = scmp.ne.s32.totalorder %s2524_s18, %s2239_s29 }
  0x30   : > { %s2244_s16 = scalar_lea.hbm %s3162_s2, 4096  ;;  %p2245_p9 = scmp.lt.s32.totalorder %s2524_s18, %s3162_s2 }
  0x31   : > { %p2242_p6 = pnand %p2240_p4, %p2213_p7  ;;  %p2246_p11 = scmp.lt.s32.totalorder %s2244_s16, %s2239_s29 }
  0x33   : > { %p2243_p8 = pneg %p2242_p6  ;;  %p2247_p12 = por %p2246_p11, %p2245_p9 }
  0x35   : > { %p2248_p2 = pnand %p2247_p12, %p2243_p8 }
  0x37   : > { %2251 = shalt.err (!%p2248_p2)
}
  0x38   : > { %s2252_s11 = scalar_lea.vmem %s2546_s20, 2048  ;;  %s2396_s13 = smov [#allocation8]  }
  0x39   : > { %p2253_p13 = scmp.ne.s32.totalorder %s2546_s20, %s2252_s11  ;;  %s2257_s30 = sshll.u32 %s2396_s13, 4  ;;  %s2258_s30 = int_to_ptr.vmem [resolvable:$false] %s2257_s30 }
  0x3a   : > { %s2259_s9 = scalar_lea.vmem %s2258_s30, 4096  ;;  %p2260_p10 = scmp.lt.s32.totalorder %s2546_s20, %s2258_s30 }
  0x3b   : > { %p2255_p4 = pnand %p2253_p13, %p2213_p7  ;;  %p2261_p0 = scmp.lt.s32.totalorder %s2259_s9, %s2252_s11 }
  0x3d   : > { %p2256_p6 = pneg %p2255_p4  ;;  %p2262_p1 = por %p2261_p0, %p2260_p10 }
  0x3f   : > { %p2263_p9 = pnand %p2262_p1, %p2256_p6 }
  0x41   : > { %2266 = shalt.err (!%p2263_p9)
}
  0x42   : > { %2162 = dma.hbm_to_vmem [thread:$0]  (!%p2483_p5), %s2524_s18, 2048, %s2546_s20, %s2489_s15, %s2392_s10, %s2392_s10, %s2393_s12  }
  0x43   : > { %p2269_p7 = pneg %p2554_p3  ;;  %s2278_s29 = scalar_lea.vmem %s2550_s21, 1024 }
  0x44   : > { %p2279_p10 = scmp.ne.s32.totalorder %s2550_s21, %s2278_s29  ;;  %p2286_p1 = scmp.lt.s32.totalorder %s2550_s21, %s2550_s21 }
  0x45   : > { %p2287_p8 = scmp.lt.s32.totalorder %s2278_s29, %s2278_s29 }
  0x46   : > { %p2281_p13 = pnand %p2279_p10, %p2269_p7 }
  0x47   : > { %p2288_p11 = por %p2287_p8, %p2286_p1 }
  0x48   : > { %p2282_p0 = pneg %p2281_p13 }
  0x4a   : > { %p2289_p12 = pnand %p2288_p11, %p2282_p0 }
  0x4c   : > { %2292 = shalt.err (!%p2289_p12)
}
  0x4d   : > { %2152 = dma.hbm_to_vmem [thread:$0]  (!%p2554_p3), %s3160_s0, 1024, %s2550_s21, [#allocation4], %s2392_s10, %s2392_s10, %s2393_s12  }
  0x4e   : > { %s2304_s18 = scalar_lea.vmem %s2558_s24, 2048  ;;  %p2312_p6 = scmp.lt.s32.totalorder %s2558_s24, %s2558_s24 }
  0x4f   : > { %p2305_p5 = scmp.ne.s32.totalorder %s2558_s24, %s2304_s18  ;;  %p2313_p9 = scmp.lt.s32.totalorder %s2304_s18, %s2304_s18 }
  0x51   : > { %p2307_p2 = pnand %p2305_p5, %p2269_p7  ;;  %p2314_p10 = por %p2313_p9, %p2312_p6 }
  0x53   : > { %p2308_p4 = pneg %p2307_p2 }
  0x55   : > { %p2315_p13 = pnand %p2314_p10, %p2308_p4 }
  0x57   : > { %2318 = shalt.err (!%p2315_p13)
}
  0x58   : > { %2155 = dma.hbm_to_vmem [thread:$0]  (!%p2554_p3), %s3164_s4, 2048, %s2558_s24, [#allocation10], %s2392_s10, %s2392_s10, %s2393_s12  }
  0x59   : > { %p3174_p0 = scmp.ne.s32.totalorder %s3172_s7, 0 }
  0x5a   : > { %p3175_p7 = scmp.eq.s32.totalorder (!%p3174_p0), %s2528_s26, 0 }
  0x5b   : > { %281 = sbr.rel (%p3174_p0) target bundleno = 2448 (0x990), region = 44 }
  0x60   : > { %2360 = dma.done.wait (%p3175_p7), [#allocation4], 1024   ;;  %p3176_p1 = pmov %p3175_p7 }
  0x61   : > { %s287_s27 = sand.u32 1, %s2528_s26   ;;  %s289_s16 = sand.u32 1, %s2381_s22  }
  0x62   : > { %2362 = vsyncadd (%p3176_p1), [#allocation4], 4294966272  ;;  %s1452_s17 = sshll.u32 %s289_s16, 7  ;;  %s288_s19 = scalar_lea.sflag [#allocation7], %s287_s27 }
  0x63   : > { %s291_s11 = scalar_lea.vmem [#allocation6], %s1452_s17  ;;  %p3177_p8 = scmp.ne.s32.totalorder %s3171_s8, 0 }
  0x65   : > { %2364 = dma.done.wait (%p3177_p8), %s288_s19, 4096  }
  0x66   : > { %2366 = vsyncadd (%p3177_p8), %s288_s19, 4294963200  ;;  %s2632_s10 = scalar_lea.vmem [#allocation8], %s1452_s17  ;;  %p3178_p3 = pmov %p3176_p1 }
  0x67   : > { %p3179_p11 = pmov %p3176_p1 }
  0x68   : > { %2368 = dma.done.wait (%p3178_p3), [#allocation10], 2048  }
  0x69   : > { %2370 = vsyncadd (%p3179_p11), [#allocation10], 4294965248  ;;  %p336_p12 = scmp.lt.s32.totalorder %s2528_s26, 1  ;;  %v2639_v0 = vld [vmem:[%s291_s11] sm:$0xff]  ;;  %v2641_v1 = vld [vmem:[%s291_s11 + $0x8] sm:$0xff]  ;;  %p3180_p5 = scmp.ne.s32.totalorder %s2528_s26, 0 }
  0x6a   : > { %v2643_v2 = vld [vmem:[%s291_s11 + $0x10] sm:$0xff]  ;;  %v2645_v3 = vld [vmem:[%s291_s11 + $0x18] sm:$0xff]  ;;  %v2647_v4 = vld [vmem:[%s291_s11 + $0x20] sm:$0xff] }
  0x6b   : > { %v2649_v5 = vld [vmem:[%s291_s11 + $0x28] sm:$0xff]  ;;  %v2651_v6 = vld [vmem:[%s291_s11 + $0x30] sm:$0xff]  ;;  %v2653_v7 = vld [vmem:[%s291_s11 + $0x38] sm:$0xff]  ;;  %s337_s12 = scalar_select %p336_p12, %s2528_s26, 1 }
  0x6c   : > { %v2655_v8 = vld [vmem:[%s291_s11 + $0x40] sm:$0xff]  ;;  %v2658_v9 = vld [vmem:[%s291_s11 + $0x48] sm:$0xff]  ;;  %v2660_v10 = vld [vmem:[%s291_s11 + $0x50] sm:$0xff] }
  0x6d   : > { %v2662_v11 = vld [vmem:[%s291_s11 + $0x58] sm:$0xff]  ;;  %v2664_v12 = vld [vmem:[%s291_s11 + $0x60] sm:$0xff]  ;;  %v2666_v13 = vld [vmem:[%s291_s11 + $0x68] sm:$0xff]  ;;  %s338_s24 = scalar_lea.vmem %s3163_s3, %s337_s12 }
  0x6e   : > { %v2668_v14 = vld [vmem:[%s291_s11 + $0x70] sm:$0xff]  ;;  %v2670_v15 = vld [vmem:[%s291_s11 + $0x78] sm:$0xff]  ;;  %v2673_v16 = vld [vmem:[%s2632_s10] sm:$0xff] }
  0x6f   : > { %v2676_v17 = vld [vmem:[%s2632_s10 + $0x8] sm:$0xff]  ;;  %v2679_v18 = vld [vmem:[%s2632_s10 + $0x10] sm:$0xff]  ;;  %v2682_v19 = vld [vmem:[%s2632_s10 + $0x18] sm:$0xff] }
  0x70   : > { %v2685_v20 = vld [vmem:[%s2632_s10 + $0x20] sm:$0xff]  ;;  %v2691_v21 = vld [vmem:[%s2632_s10 + $0x28] sm:$0xff]  ;;  %v2694_v22 = vld [vmem:[%s2632_s10 + $0x30] sm:$0xff]  ;;  %375 = sbr.rel (%p3180_p5) target bundleno = 352 (0x160), region = 64 }
  0x71   : > { %v2697_v23 = vld [vmem:[%s2632_s10 + $0x38] sm:$0xff]  ;;  %v2700_v24 = vld [vmem:[%s2632_s10 + $0x40] sm:$0xff]  ;;  %v2703_v25 = vld [vmem:[%s2632_s10 + $0x48] sm:$0xff] }
  0x72   : > { %v2706_v26 = vld [vmem:[%s2632_s10 + $0x50] sm:$0xff]  ;;  %v2709_v27 = vld [vmem:[%s2632_s10 + $0x58] sm:$0xff]  ;;  %v2712_v28 = vld [vmem:[%s2632_s10 + $0x60] sm:$0xff] }
  0x73   : > { %v2715_v29 = vld [vmem:[%s2632_s10 + $0x68] sm:$0xff]  ;;  %v2718_v30 = vld [vmem:[%s2632_s10 + $0x70] sm:$0xff]  ;;  %v2721_v31 = vld [vmem:[%s2632_s10 + $0x78] sm:$0xff] }
  0x74   : > { %v2723_v32 = vld [vmem:[%s338_s24] sm:$0x1] }
  0x75   : > { %1666 = vmatprep.subr.mxu0 %v2670_v15  ;;  %2069 = vmatprep.subr.mxu1 %v2670_v15  ;;  %v376_v33 = vld [vmem:[#allocation3] sm:$0xff]  ;;  %v377_v35 = vld [vmem:[#allocation3 + $0x8] sm:$0xff]  ;;  %v378_v37 = vld [vmem:[#allocation3 + $0x10] sm:$0xff]  ;;  %v385_v41 = vlaneseq }
  0x76   : > { %1667 = vmatpush3.msra.mxu0 %v2670_v15  ;;  %2085 = vmatpush3.msra.mxu1 %v2670_v15  ;;  %v380_v34 = vld [vmem:[#allocation3 + $0x20] sm:$0xff]  ;;  %v381_v36 = vld [vmem:[#allocation3 + $0x28] sm:$0xff]  ;;  %v382_v38 = vld [vmem:[#allocation3 + $0x30] sm:$0xff] }
  0x77   : > { %1668 = vmatprep.subr.mxu0 %v2668_v14  ;;  %2070 = vmatprep.subr.mxu1 %v2668_v14  ;;  %v379_v39 = vld [vmem:[#allocation3 + $0x18] sm:$0xff]  ;;  %v386_v42 = vshrl.u32 %v385_v41, 7 }
  0x78   : > { %1669 = vmatpush3.msra.mxu0 %v2668_v14  ;;  %2086 = vmatpush3.msra.mxu1 %v2668_v14  ;;  %v383_v40 = vld [vmem:[#allocation3 + $0x38] sm:$0xff] }
  0x79   : > { %1670 = vmatprep.subr.mxu0 %v2666_v13  ;;  %2071 = vmatprep.subr.mxu1 %v2666_v13  ;;  %v387_v43 = vsub.s32 0, %v386_v42 }
  0x7a   : > { %1671 = vmatpush3.msra.mxu0 %v2666_v13  ;;  %2087 = vmatpush3.msra.mxu1 %v2666_v13 }
  0x7b   : > { %1672 = vmatprep.subr.mxu0 %v2664_v12  ;;  %2072 = vmatprep.subr.mxu1 %v2664_v12  ;;  %v388_v44 = vrot.slane %v2723_v32, %v387_v43 }
  0x7c   : > { %1673 = vmatpush3.msra.mxu0 %v2664_v12  ;;  %2088 = vmatpush3.msra.mxu1 %v2664_v12 }
  0x7d   : > { %1674 = vmatprep.subr.mxu0 %v2662_v11  ;;  %2073 = vmatprep.subr.mxu1 %v2662_v11 }
  0x7e   : > { %1675 = vmatpush3.msra.mxu0 %v2662_v11  ;;  %2089 = vmatpush3.msra.mxu1 %v2662_v11 }
  0x7f   : > { %1676 = vmatprep.subr.mxu0 %v2660_v10  ;;  %2074 = vmatprep.subr.mxu1 %v2660_v10 }
  0x80   : > { %1677 = vmatpush3.msra.mxu0 %v2660_v10  ;;  %2090 = vmatpush3.msra.mxu1 %v2660_v10 }
  0x81   : > { %1678 = vmatprep.subr.mxu0 %v2658_v9  ;;  %2075 = vmatprep.subr.mxu1 %v2658_v9 }
  0x82   : > { %1679 = vmatpush3.msra.mxu0 %v2658_v9  ;;  %2091 = vmatpush3.msra.mxu1 %v2658_v9 }
  0x83   : > { %1680 = vmatprep.subr.mxu0 %v2655_v8  ;;  %2076 = vmatprep.subr.mxu1 %v2655_v8 }
  0x84   : > { %1681 = vmatpush3.msra.mxu0 %v2655_v8  ;;  %2092 = vmatpush3.msra.mxu1 %v2655_v8 }
  0x85   : > { %1682 = vmatprep.subr.mxu0 %v2653_v7  ;;  %2077 = vmatprep.subr.mxu1 %v2653_v7 }
  0x86   : > { %1683 = vmatpush3.msra.mxu0 %v2653_v7  ;;  %2093 = vmatpush3.msra.mxu1 %v2653_v7 }
  0x87   : > { %1684 = vmatprep.subr.mxu0 %v2651_v6  ;;  %2078 = vmatprep.subr.mxu1 %v2651_v6 }
  0x88   : > { %1685 = vmatpush3.msra.mxu0 %v2651_v6  ;;  %2094 = vmatpush3.msra.mxu1 %v2651_v6 }
  0x89   : > { %1686 = vmatprep.subr.mxu0 %v2649_v5  ;;  %2079 = vmatprep.subr.mxu1 %v2649_v5 }
  0x8a   : > { %1687 = vmatpush3.msra.mxu0 %v2649_v5  ;;  %2095 = vmatpush3.msra.mxu1 %v2649_v5 }
  0x8b   : > { %1688 = vmatprep.subr.mxu0 %v2647_v4  ;;  %2080 = vmatprep.subr.mxu1 %v2647_v4 }
  0x8c   : > { %1689 = vmatpush3.msra.mxu0 %v2647_v4  ;;  %2096 = vmatpush3.msra.mxu1 %v2647_v4 }
  0x8d   : > { %1690 = vmatprep.subr.mxu0 %v2645_v3  ;;  %2081 = vmatprep.subr.mxu1 %v2645_v3 }
  0x8e   : > { %1691 = vmatpush3.msra.mxu0 %v2645_v3  ;;  %2097 = vmatpush3.msra.mxu1 %v2645_v3 }
  0x8f   : > { %1692 = vmatprep.subr.mxu0 %v2643_v2  ;;  %2082 = vmatprep.subr.mxu1 %v2643_v2 }
  0x90   : > { %1693 = vmatpush3.msra.mxu0 %v2643_v2  ;;  %2098 = vmatpush3.msra.mxu1 %v2643_v2 }
  0x91   : > { %1694 = vmatprep.subr.mxu0 %v2641_v1  ;;  %2083 = vmatprep.subr.mxu1 %v2641_v1 }
  0x92   : > { %1695 = vmatpush3.msra.mxu0 %v2641_v1  ;;  %2099 = vmatpush3.msra.mxu1 %v2641_v1 }
  0x93   : > { %1696 = vmatprep.subr.mxu0 %v2639_v0  ;;  %2084 = vmatprep.subr.mxu1 %v2639_v0 }
  0x94   : > { %1697 = vmatpush3.msra.mxu0 %v2639_v0  ;;  %2100 = vmatpush3.msra.mxu1 %v2639_v0 }
  0x95   : > { %1698 = vmatprep.mubr.f32.mxu0 %v376_v33  ;;  %1704 = vmatprep.mubr.f32.mxu1 %v380_v34 }
  0x96   : > { %1699 = vmatmul.mubr.f32.vlgmr.msra.gmra.mxu0 %v377_v35  ;;  %1705 = vmatmul.mubr.f32.vlgmr.msra.gmra.mxu1 %v381_v36 }
  0x97   : > { %1701 = vmatprep.mubr.f32.mxu0 %v378_v37  ;;  %1707 = vmatprep.mubr.f32.mxu1 %v382_v38 }
  0x9a   : > { %1702 = vmatmul.mubr.f32.gmra.mxu0 %v379_v39  ;;  %1708 = vmatmul.mubr.f32.gmra.mxu1 %v383_v40 }
 0x156   : > { %v1700_v45 = vpop.f32.mrf.mxu0  ;;  %v1706_v46 = vpop.f32.mrf.mxu1 }
 0x157   : > { %v462_v47 = vadd.f32 %v1700_v45, %v388_v44  ;;  %v482_v48 = vadd.f32 %v1706_v46, %v388_v44 }
 0x158   : > { %v456_v49 = vpop.f32.mrf.mxu0  ;;  %v476_v50 = vpop.f32.mrf.mxu1 }
 0x159   : > { %496 = vst [vmem:[#allocation2] sm:$0xff] %v462_v47  ;;  %500 = vst [vmem:[#allocation2 + $0x20] sm:$0xff] %v482_v48  ;;  %v457_v51 = vadd.f32 %v456_v49, %v388_v44  ;;  %v477_v52 = vadd.f32 %v476_v50, %v388_v44 }
 0x15a   : > { %v1703_v53 = vpop.f32.mrf.mxu0  ;;  %v1709_v54 = vpop.f32.mrf.mxu1 }
 0x15b   : > { %495 = vst [vmem:[#allocation2 + $0x30] sm:$0xff] %v457_v51  ;;  %499 = vst [vmem:[#allocation2 + $0x8] sm:$0xff] %v477_v52  ;;  %v472_v55 = vadd.f32 %v1703_v53, %v388_v44  ;;  %v492_v56 = vadd.f32 %v1709_v54, %v388_v44 }
 0x15c   : > { %v466_v57 = vpop.f32.mrf.mxu0  ;;  %v486_v58 = vpop.f32.mrf.mxu1 }
 0x15d   : > { %498 = vst [vmem:[#allocation2 + $0x10] sm:$0xff] %v472_v55  ;;  %502 = vst [vmem:[#allocation2 + $0x38] sm:$0xff] %v492_v56  ;;  %v467_v59 = vadd.f32 %v466_v57, %v388_v44  ;;  %v487_v60 = vadd.f32 %v486_v58, %v388_v44 }
 0x15f   : > { %497 = vst [vmem:[#allocation2 + $0x18] sm:$0xff] %v467_v59  ;;  %501 = vst [vmem:[#allocation2 + $0x28] sm:$0xff] %v487_v60 }
 0x160 PF: > { %p1456_p2 = scmp.le.s32.totalorder %s2528_s26, 0 }
 0x162   : > { %506 = sbr.rel (%p1456_p2) target bundleno = 594 (0x252), region = 68 }
 0x167   : > { %1710 = vmatprep.subr.mxu0 %v2670_v15  ;;  %2101 = vmatprep.subr.mxu1 %v2670_v15  ;;  %v507_v61 = vld [vmem:[#allocation2 + $0x30] sm:$0xff]  ;;  %v511_v62 = vld [vmem:[#allocation2 + $0x8] sm:$0xff]  ;;  %v508_v63 = vld [vmem:[#allocation2] sm:$0xff] }
 0x168   : > { %1711 = vmatpush3.msra.mxu0 %v2670_v15  ;;  %2117 = vmatpush3.msra.mxu1 %v2670_v15 }
 0x169   : > { %1712 = vmatprep.subr.mxu0 %v2668_v14  ;;  %2102 = vmatprep.subr.mxu1 %v2668_v14 }
 0x16a   : > { %1713 = vmatpush3.msra.mxu0 %v2668_v14  ;;  %2118 = vmatpush3.msra.mxu1 %v2668_v14 }
 0x16b   : > { %1714 = vmatprep.subr.mxu0 %v2666_v13  ;;  %2103 = vmatprep.subr.mxu1 %v2666_v13 }
 0x16c   : > { %1715 = vmatpush3.msra.mxu0 %v2666_v13  ;;  %2119 = vmatpush3.msra.mxu1 %v2666_v13 }
 0x16d   : > { %1716 = vmatprep.subr.mxu0 %v2664_v12  ;;  %2104 = vmatprep.subr.mxu1 %v2664_v12 }
 0x16e   : > { %1717 = vmatpush3.msra.mxu0 %v2664_v12  ;;  %2120 = vmatpush3.msra.mxu1 %v2664_v12 }
 0x16f   : > { %1718 = vmatprep.subr.mxu0 %v2662_v11  ;;  %2105 = vmatprep.subr.mxu1 %v2662_v11 }
 0x170   : > { %1719 = vmatpush3.msra.mxu0 %v2662_v11  ;;  %2121 = vmatpush3.msra.mxu1 %v2662_v11 }
 0x171   : > { %1720 = vmatprep.subr.mxu0 %v2660_v10  ;;  %2106 = vmatprep.subr.mxu1 %v2660_v10 }
 0x172   : > { %1721 = vmatpush3.msra.mxu0 %v2660_v10  ;;  %2122 = vmatpush3.msra.mxu1 %v2660_v10 }
 0x173   : > { %1722 = vmatprep.subr.mxu0 %v2658_v9  ;;  %2107 = vmatprep.subr.mxu1 %v2658_v9 }
 0x174   : > { %1723 = vmatpush3.msra.mxu0 %v2658_v9  ;;  %2123 = vmatpush3.msra.mxu1 %v2658_v9 }
 0x175   : > { %1724 = vmatprep.subr.mxu0 %v2655_v8  ;;  %2108 = vmatprep.subr.mxu1 %v2655_v8 }
 0x176   : > { %1725 = vmatpush3.msra.mxu0 %v2655_v8  ;;  %2124 = vmatpush3.msra.mxu1 %v2655_v8 }
 0x177   : > { %1726 = vmatprep.subr.mxu0 %v2653_v7  ;;  %2109 = vmatprep.subr.mxu1 %v2653_v7 }
 0x178   : > { %1727 = vmatpush3.msra.mxu0 %v2653_v7  ;;  %2125 = vmatpush3.msra.mxu1 %v2653_v7 }
 0x179   : > { %1728 = vmatprep.subr.mxu0 %v2651_v6  ;;  %2110 = vmatprep.subr.mxu1 %v2651_v6 }
 0x17a   : > { %1729 = vmatpush3.msra.mxu0 %v2651_v6  ;;  %2126 = vmatpush3.msra.mxu1 %v2651_v6  ;;  %v516_v6 = vlaneseq }
 0x17b   : > { %1730 = vmatprep.subr.mxu0 %v2649_v5  ;;  %2111 = vmatprep.subr.mxu1 %v2649_v5 }
 0x17c   : > { %1731 = vmatpush3.msra.mxu0 %v2649_v5  ;;  %2127 = vmatpush3.msra.mxu1 %v2649_v5  ;;  %v514_v5 = vld [vmem:[#allocation2 + $0x38] sm:$0xff]  ;;  %v517_v7 = vshrl.u32 %v516_v6, 7 }
 0x17d   : > { %1732 = vmatprep.subr.mxu0 %v2647_v4  ;;  %2112 = vmatprep.subr.mxu1 %v2647_v4 }
 0x17e   : > { %1733 = vmatpush3.msra.mxu0 %v2647_v4  ;;  %2128 = vmatpush3.msra.mxu1 %v2647_v4  ;;  %v513_v4 = vld [vmem:[#allocation2 + $0x28] sm:$0xff]  ;;  %v518_v8 = vsub.s32 0, %v517_v7 }
 0x17f   : > { %1734 = vmatprep.subr.mxu0 %v2645_v3  ;;  %2113 = vmatprep.subr.mxu1 %v2645_v3 }
 0x180   : > { %1735 = vmatpush3.msra.mxu0 %v2645_v3  ;;  %2129 = vmatpush3.msra.mxu1 %v2645_v3  ;;  %v512_v3 = vld [vmem:[#allocation2 + $0x20] sm:$0xff]  ;;  %v519_v9 = vrot.slane %v2723_v32, %v518_v8 }
 0x181   : > { %1736 = vmatprep.subr.mxu0 %v2643_v2  ;;  %2114 = vmatprep.subr.mxu1 %v2643_v2 }
 0x182   : > { %1737 = vmatpush3.msra.mxu0 %v2643_v2  ;;  %2130 = vmatpush3.msra.mxu1 %v2643_v2  ;;  %v509_v2 = vld [vmem:[#allocation2 + $0x18] sm:$0xff] }
 0x183   : > { %1738 = vmatprep.subr.mxu0 %v2641_v1  ;;  %2115 = vmatprep.subr.mxu1 %v2641_v1 }
 0x184   : > { %1739 = vmatpush3.msra.mxu0 %v2641_v1  ;;  %2131 = vmatpush3.msra.mxu1 %v2641_v1  ;;  %v510_v1 = vld [vmem:[#allocation2 + $0x10] sm:$0xff] }
 0x185   : > { %1740 = vmatprep.subr.mxu0 %v2639_v0  ;;  %2116 = vmatprep.subr.mxu1 %v2639_v0 }
 0x186   : > { %1741 = vmatpush3.msra.mxu0 %v2639_v0  ;;  %2132 = vmatpush3.msra.mxu1 %v2639_v0 }
 0x187   : > { %1742 = vmatprep.mubr.f32.mxu0 %v507_v61  ;;  %1748 = vmatprep.mubr.f32.mxu1 %v511_v62 }
 0x188   : > { %1743 = vmatmul.mubr.f32.vlgmr.msra.gmra.mxu0 %v508_v63  ;;  %1749 = vmatmul.mubr.f32.vlgmr.msra.gmra.mxu1 %v512_v3 }
 0x189   : > { %1745 = vmatprep.mubr.f32.mxu0 %v509_v2  ;;  %1751 = vmatprep.mubr.f32.mxu1 %v513_v4 }
 0x18c   : > { %1746 = vmatmul.mubr.f32.gmra.mxu0 %v510_v1  ;;  %1752 = vmatmul.mubr.f32.gmra.mxu1 %v514_v5 }
 0x248   : > { %v1744_v10 = vpop.f32.mrf.mxu0  ;;  %v1750_v11 = vpop.f32.mrf.mxu1 }
 0x249   : > { %v593_v0 = vadd.f32 %v1744_v10, %v519_v9  ;;  %v613_v12 = vadd.f32 %v1750_v11, %v519_v9 }
 0x24a   : > { %v587_v13 = vpop.f32.mrf.mxu0  ;;  %v607_v14 = vpop.f32.mrf.mxu1 }
 0x24b   : > { %627 = vst [vmem:[#allocation2] sm:$0xff] %v593_v0  ;;  %631 = vst [vmem:[#allocation2 + $0x20] sm:$0xff] %v613_v12  ;;  %v588_v15 = vadd.f32 %v587_v13, %v519_v9  ;;  %v608_v33 = vadd.f32 %v607_v14, %v519_v9 }
 0x24c   : > { %v1747_v34 = vpop.f32.mrf.mxu0  ;;  %v1753_v35 = vpop.f32.mrf.mxu1 }
 0x24d   : > { %626 = vst [vmem:[#allocation2 + $0x30] sm:$0xff] %v588_v15  ;;  %630 = vst [vmem:[#allocation2 + $0x8] sm:$0xff] %v608_v33  ;;  %v603_v36 = vadd.f32 %v1747_v34, %v519_v9  ;;  %v623_v37 = vadd.f32 %v1753_v35, %v519_v9 }
 0x24e   : > { %v597_v38 = vpop.f32.mrf.mxu0  ;;  %v617_v39 = vpop.f32.mrf.mxu1 }
 0x24f   : > { %629 = vst [vmem:[#allocation2 + $0x10] sm:$0xff] %v603_v36  ;;  %633 = vst [vmem:[#allocation2 + $0x38] sm:$0xff] %v623_v37  ;;  %v598_v32 = vadd.f32 %v597_v38, %v519_v9  ;;  %v618_v40 = vadd.f32 %v617_v39, %v519_v9 }
 0x251   : > { %628 = vst [vmem:[#allocation2 + $0x18] sm:$0xff] %v598_v32  ;;  %632 = vst [vmem:[#allocation2 + $0x28] sm:$0xff] %v618_v40 }
 0x252 PF: > { %v2397_v41 = vmov 0.0   ;;  %vm2398_vm0 = vmmov 0   ;;  %v709_v47 = vld [vmem:[#allocation2] sm:$0xff]  ;;  %p1457_p4 = scmp.ne.s32.totalorder %s2528_s26, 1 }
 0x253   : > { %1754 = vmatprep.subr.mxu0 %v2397_v41  ;;  %1786 = vmatprep.mubr.msk.f32.mxu0 %vm2398_vm0, %v2397_v41 }
 0x254   : > { %1755 = vmatpush3.msra.mxu0 %v2721_v31  ;;  %1789 = vmatprep.subr.mxu1 %v2397_v41  ;;  %v634_v42 = vld [vmem:[#allocation2 + $0x30] sm:$0xff]  ;;  %v934_v62 = vld [vmem:[#allocation2 + $0x8] sm:$0xff] }
 0x255   : > { %1756 = vmatprep.subr.mxu0 %v2397_v41  ;;  %1790 = vmatpush3.msra.mxu1 %v2721_v31 }
 0x256   : > { %1757 = vmatpush3.msra.mxu0 %v2718_v30  ;;  %1791 = vmatprep.subr.mxu1 %v2397_v41  ;;  %v859_v57 = vld [vmem:[#allocation2 + $0x10] sm:$0xff] }
 0x257   : > { %1758 = vmatprep.subr.mxu0 %v2397_v41  ;;  %1792 = vmatpush3.msra.mxu1 %v2718_v30 }
 0x258   : > { %1759 = vmatpush3.msra.mxu0 %v2715_v29  ;;  %1793 = vmatprep.subr.mxu1 %v2397_v41  ;;  %v784_v52 = vld [vmem:[#allocation2 + $0x18] sm:$0xff] }
 0x259   : > { %1760 = vmatprep.subr.mxu0 %v2397_v41  ;;  %1794 = vmatpush3.msra.mxu1 %v2715_v29 }
 0x25a   : > { %1761 = vmatpush3.msra.mxu0 %v2712_v28  ;;  %1795 = vmatprep.subr.mxu1 %v2397_v41 }
 0x25b   : > { %1762 = vmatprep.subr.mxu0 %v2397_v41  ;;  %1796 = vmatpush3.msra.mxu1 %v2712_v28 }
 0x25c   : > { %1763 = vmatpush3.msra.mxu0 %v2709_v27  ;;  %1797 = vmatprep.subr.mxu1 %v2397_v41 }
 0x25d   : > { %1764 = vmatprep.subr.mxu0 %v2397_v41  ;;  %1798 = vmatpush3.msra.mxu1 %v2709_v27 }
 0x25e   : > { %1765 = vmatpush3.msra.mxu0 %v2706_v26  ;;  %1799 = vmatprep.subr.mxu1 %v2397_v41 }
 0x25f   : > { %1766 = vmatprep.subr.mxu0 %v2397_v41  ;;  %1800 = vmatpush3.msra.mxu1 %v2706_v26 }
 0x260   : > { %1767 = vmatpush3.msra.mxu0 %v2703_v25  ;;  %1801 = vmatprep.subr.mxu1 %v2397_v41 }
 0x261   : > { %1768 = vmatprep.subr.mxu0 %v2397_v41  ;;  %1802 = vmatpush3.msra.mxu1 %v2703_v25 }
 0x262   : > { %1769 = vmatpush3.msra.mxu0 %v2700_v24  ;;  %1803 = vmatprep.subr.mxu1 %v2397_v41 }
 0x263   : > { %1770 = vmatprep.subr.mxu0 %v2397_v41  ;;  %1804 = vmatpush3.msra.mxu1 %v2700_v24 }
 0x264   : > { %1771 = vmatpush3.msra.mxu0 %v2697_v23  ;;  %1805 = vmatprep.subr.mxu1 %v2397_v41 }
 0x265   : > { %1772 = vmatprep.subr.mxu0 %v2397_v41  ;;  %1806 = vmatpush3.msra.mxu1 %v2697_v23 }
 0x266   : > { %1773 = vmatpush3.msra.mxu0 %v2694_v22  ;;  %1807 = vmatprep.subr.mxu1 %v2397_v41 }
 0x267   : > { %1774 = vmatprep.subr.mxu0 %v2397_v41  ;;  %1808 = vmatpush3.msra.mxu1 %v2694_v22 }
 0x268   : > { %1775 = vmatpush3.msra.mxu0 %v2691_v21  ;;  %1809 = vmatprep.subr.mxu1 %v2397_v41 }
 0x269   : > { %1776 = vmatprep.subr.mxu0 %v2397_v41  ;;  %1810 = vmatpush3.msra.mxu1 %v2691_v21 }
 0x26a   : > { %1777 = vmatpush3.msra.mxu0 %v2685_v20  ;;  %1811 = vmatprep.subr.mxu1 %v2397_v41 }
 0x26b   : > { %1778 = vmatprep.subr.mxu0 %v2397_v41  ;;  %1812 = vmatpush3.msra.mxu1 %v2685_v20 }
 0x26c   : > { %1779 = vmatpush3.msra.mxu0 %v2682_v19  ;;  %1813 = vmatprep.subr.mxu1 %v2397_v41 }
 0x26d   : > { %1780 = vmatprep.subr.mxu0 %v2397_v41  ;;  %1814 = vmatpush3.msra.mxu1 %v2682_v19 }
 0x26e   : > { %1781 = vmatpush3.msra.mxu0 %v2679_v18  ;;  %1815 = vmatprep.subr.mxu1 %v2397_v41 }
 0x26f   : > { %1782 = vmatprep.subr.mxu0 %v2397_v41  ;;  %1816 = vmatpush3.msra.mxu1 %v2679_v18 }
 0x270   : > { %1783 = vmatpush3.msra.mxu0 %v2676_v17  ;;  %1817 = vmatprep.subr.mxu1 %v2397_v41 }
 0x271   : > { %1784 = vmatprep.subr.mxu0 %v2397_v41  ;;  %1818 = vmatpush3.msra.mxu1 %v2676_v17 }
 0x272   : > { %1785 = vmatpush3.msra.mxu0 %v2673_v16  ;;  %1819 = vmatprep.subr.mxu1 %v2397_v41 }
 0x273   : > { %1787 = vmatmul.mubr.f32.vlgmr.msra.gmra.mxu0 %v2397_v41  ;;  %1820 = vmatpush3.msra.mxu1 %v2673_v16 }
 0x274   : > { %1821 = vmatprep.mubr.msk.f32.mxu1 %vm2398_vm0, %v2397_v41  ;;  %1824 = vmatprep.subr.mxu0 %v2397_v41 }
 0x275   : > { %1825 = vmatpush3.msra.mxu0 %v2721_v31  ;;  %1856 = vmatprep.mubr.msk.f32.mxu0 %vm2398_vm0, %v2397_v41 }
 0x276   : > { %1826 = vmatprep.subr.mxu0 %v2397_v41  ;;  %1859 = vmatprep.subr.mxu1 %v2397_v41 }
 0x277   : > { %1827 = vmatpush3.msra.mxu0 %v2718_v30 }
 0x278   : > { %1828 = vmatprep.subr.mxu0 %v2397_v41 }
 0x279   : > { %1829 = vmatpush3.msra.mxu0 %v2715_v29 }
 0x27a   : > { %1830 = vmatprep.subr.mxu0 %v2397_v41 }
 0x27b   : > { %1831 = vmatpush3.msra.mxu0 %v2712_v28 }
 0x27c   : > { %1832 = vmatprep.subr.mxu0 %v2397_v41 }
 0x27d   : > { %1833 = vmatpush3.msra.mxu0 %v2709_v27 }
 0x27e   : > { %1834 = vmatprep.subr.mxu0 %v2397_v41 }
 0x27f   : > { %1835 = vmatpush3.msra.mxu0 %v2706_v26 }
 0x280   : > { %1836 = vmatprep.subr.mxu0 %v2397_v41 }
 0x281   : > { %1837 = vmatpush3.msra.mxu0 %v2703_v25 }
 0x282   : > { %1838 = vmatprep.subr.mxu0 %v2397_v41 }
 0x283   : > { %1839 = vmatpush3.msra.mxu0 %v2700_v24 }
 0x284   : > { %1840 = vmatprep.subr.mxu0 %v2397_v41 }
 0x285   : > { %1841 = vmatpush3.msra.mxu0 %v2697_v23 }
 0x286   : > { %1842 = vmatprep.subr.mxu0 %v2397_v41 }
 0x287   : > { %1843 = vmatpush3.msra.mxu0 %v2694_v22 }
 0x288   : > { %1844 = vmatprep.subr.mxu0 %v2397_v41 }
 0x289   : > { %1845 = vmatpush3.msra.mxu0 %v2691_v21 }
 0x28a   : > { %1846 = vmatprep.subr.mxu0 %v2397_v41 }
 0x28b   : > { %1847 = vmatpush3.msra.mxu0 %v2685_v20 }
 0x28c   : > { %1848 = vmatprep.subr.mxu0 %v2397_v41 }
 0x28d   : > { %1849 = vmatpush3.msra.mxu0 %v2682_v19 }
 0x28e   : > { %1850 = vmatprep.subr.mxu0 %v2397_v41 }
 0x28f   : > { %1851 = vmatpush3.msra.mxu0 %v2679_v18 }
 0x290   : > { %1852 = vmatprep.subr.mxu0 %v2397_v41 }
 0x291   : > { %1853 = vmatpush3.msra.mxu0 %v2676_v17 }
 0x292   : > { %1854 = vmatprep.subr.mxu0 %v2397_v41 }
 0x293   : > { %1855 = vmatpush3.msra.mxu0 %v2673_v16 }
 0x294   : > { %1894 = vmatprep.subr.mxu0 %v2397_v41 }
 0x333   : > { %v701_v43 = vpop.f32.mrf.mxu0 }
 0x334   : > { %v705_v44 = vadd.f32 %v701_v43, %v634_v42 }
 0x335   : > { %v1788_v45 = vpop.f32.mrf.mxu0 }
 0x336   : > { %v706_v46 = vmax.f32 %v705_v44, 0.0 }
 0x338   : > { %707 = vst [vmem:[#allocation2 + $0x30] sm:$0xff] %v706_v46  ;;  %1822 = vmatmul.mubr.f32.vlgmr.msra.gmra.mxu1 %v706_v46 }
 0x339   : > { %1860 = vmatpush3.msra.mxu1 %v2721_v31  ;;  %1891 = vmatprep.mubr.msk.f32.mxu1 %vm2398_vm0, %v2397_v41 }
 0x33a   : > { %1861 = vmatprep.subr.mxu1 %v2397_v41 }
 0x33b   : > { %1862 = vmatpush3.msra.mxu1 %v2718_v30 }
 0x33c   : > { %1863 = vmatprep.subr.mxu1 %v2397_v41 }
 0x33d   : > { %1864 = vmatpush3.msra.mxu1 %v2715_v29 }
 0x33e   : > { %1865 = vmatprep.subr.mxu1 %v2397_v41 }
 0x33f   : > { %1866 = vmatpush3.msra.mxu1 %v2712_v28 }
 0x340   : > { %1867 = vmatprep.subr.mxu1 %v2397_v41 }
 0x341   : > { %1868 = vmatpush3.msra.mxu1 %v2709_v27 }
 0x342   : > { %1869 = vmatprep.subr.mxu1 %v2397_v41 }
 0x343   : > { %1870 = vmatpush3.msra.mxu1 %v2706_v26 }
 0x344   : > { %1871 = vmatprep.subr.mxu1 %v2397_v41 }
 0x345   : > { %1872 = vmatpush3.msra.mxu1 %v2703_v25 }
 0x346   : > { %1873 = vmatprep.subr.mxu1 %v2397_v41 }
 0x347   : > { %1874 = vmatpush3.msra.mxu1 %v2700_v24 }
 0x348   : > { %1875 = vmatprep.subr.mxu1 %v2397_v41 }
 0x349   : > { %1876 = vmatpush3.msra.mxu1 %v2697_v23 }
 0x34a   : > { %1877 = vmatprep.subr.mxu1 %v2397_v41 }
 0x34b   : > { %1878 = vmatpush3.msra.mxu1 %v2694_v22 }
 0x34c   : > { %1879 = vmatprep.subr.mxu1 %v2397_v41 }
 0x34d   : > { %1880 = vmatpush3.msra.mxu1 %v2691_v21 }
 0x34e   : > { %1881 = vmatprep.subr.mxu1 %v2397_v41 }
 0x34f   : > { %1882 = vmatpush3.msra.mxu1 %v2685_v20 }
 0x350   : > { %1883 = vmatprep.subr.mxu1 %v2397_v41 }
 0x351   : > { %1884 = vmatpush3.msra.mxu1 %v2682_v19 }
 0x352   : > { %1885 = vmatprep.subr.mxu1 %v2397_v41 }
 0x353   : > { %1886 = vmatpush3.msra.mxu1 %v2679_v18 }
 0x354   : > { %1887 = vmatprep.subr.mxu1 %v2397_v41 }
 0x355   : > { %1888 = vmatpush3.msra.mxu1 %v2676_v17 }
 0x356   : > { %1889 = vmatprep.subr.mxu1 %v2397_v41 }
 0x357   : > { %1890 = vmatpush3.msra.mxu1 %v2673_v16 }
 0x358   : > { %1929 = vmatprep.subr.mxu1 %v2397_v41 }
 0x3f8   : > { %v776_v48 = vpop.f32.mrf.mxu1 }
 0x3f9   : > { %v780_v49 = vadd.f32 %v776_v48, %v709_v47 }
 0x3fa   : > { %v1823_v50 = vpop.f32.mrf.mxu1 }
 0x3fb   : > { %v781_v51 = vmax.f32 %v780_v49, 0.0 }
 0x3fd   : > { %782 = vst [vmem:[#allocation2] sm:$0xff] %v781_v51  ;;  %1857 = vmatmul.mubr.f32.vlgmr.msra.gmra.mxu0 %v781_v51 }
 0x3fe   : > { %1895 = vmatpush3.msra.mxu0 %v2721_v31  ;;  %1926 = vmatprep.mubr.msk.f32.mxu0 %vm2398_vm0, %v2397_v41 }
 0x3ff   : > { %1896 = vmatprep.subr.mxu0 %v2397_v41 }
 0x400   : > { %1897 = vmatpush3.msra.mxu0 %v2718_v30 }
 0x401   : > { %1898 = vmatprep.subr.mxu0 %v2397_v41 }
 0x402   : > { %1899 = vmatpush3.msra.mxu0 %v2715_v29 }
 0x403   : > { %1900 = vmatprep.subr.mxu0 %v2397_v41 }
 0x404   : > { %1901 = vmatpush3.msra.mxu0 %v2712_v28 }
 0x405   : > { %1902 = vmatprep.subr.mxu0 %v2397_v41 }
 0x406   : > { %1903 = vmatpush3.msra.mxu0 %v2709_v27 }
 0x407   : > { %1904 = vmatprep.subr.mxu0 %v2397_v41 }
 0x408   : > { %1905 = vmatpush3.msra.mxu0 %v2706_v26 }
 0x409   : > { %1906 = vmatprep.subr.mxu0 %v2397_v41 }
 0x40a   : > { %1907 = vmatpush3.msra.mxu0 %v2703_v25 }
 0x40b   : > { %1908 = vmatprep.subr.mxu0 %v2397_v41 }
 0x40c   : > { %1909 = vmatpush3.msra.mxu0 %v2700_v24 }
 0x40d   : > { %1910 = vmatprep.subr.mxu0 %v2397_v41 }
 0x40e   : > { %1911 = vmatpush3.msra.mxu0 %v2697_v23 }
 0x40f   : > { %1912 = vmatprep.subr.mxu0 %v2397_v41 }
 0x410   : > { %1913 = vmatpush3.msra.mxu0 %v2694_v22 }
 0x411   : > { %1914 = vmatprep.subr.mxu0 %v2397_v41 }
 0x412   : > { %1915 = vmatpush3.msra.mxu0 %v2691_v21 }
 0x413   : > { %1916 = vmatprep.subr.mxu0 %v2397_v41 }
 0x414   : > { %1917 = vmatpush3.msra.mxu0 %v2685_v20 }
 0x415   : > { %1918 = vmatprep.subr.mxu0 %v2397_v41 }
 0x416   : > { %1919 = vmatpush3.msra.mxu0 %v2682_v19 }
 0x417   : > { %1920 = vmatprep.subr.mxu0 %v2397_v41 }
 0x418   : > { %1921 = vmatpush3.msra.mxu0 %v2679_v18 }
 0x419   : > { %1922 = vmatprep.subr.mxu0 %v2397_v41 }
 0x41a   : > { %1923 = vmatpush3.msra.mxu0 %v2676_v17 }
 0x41b   : > { %1924 = vmatprep.subr.mxu0 %v2397_v41 }
 0x41c   : > { %1925 = vmatpush3.msra.mxu0 %v2673_v16 }
 0x41d   : > { %1964 = vmatprep.subr.mxu0 %v2397_v41 }
 0x4bd   : > { %v851_v53 = vpop.f32.mrf.mxu0 }
 0x4be   : > { %v855_v54 = vadd.f32 %v851_v53, %v784_v52 }
 0x4bf   : > { %v1858_v55 = vpop.f32.mrf.mxu0 }
 0x4c0   : > { %v856_v56 = vmax.f32 %v855_v54, 0.0 }
 0x4c2   : > { %857 = vst [vmem:[#allocation2 + $0x18] sm:$0xff] %v856_v56  ;;  %1892 = vmatmul.mubr.f32.vlgmr.msra.gmra.mxu1 %v856_v56 }
 0x4c3   : > { %1930 = vmatpush3.msra.mxu1 %v2721_v31  ;;  %1961 = vmatprep.mubr.msk.f32.mxu1 %vm2398_vm0, %v2397_v41 }
 0x4c4   : > { %1931 = vmatprep.subr.mxu1 %v2397_v41 }
 0x4c5   : > { %1932 = vmatpush3.msra.mxu1 %v2718_v30 }
 0x4c6   : > { %1933 = vmatprep.subr.mxu1 %v2397_v41 }
 0x4c7   : > { %1934 = vmatpush3.msra.mxu1 %v2715_v29 }
 0x4c8   : > { %1935 = vmatprep.subr.mxu1 %v2397_v41 }
 0x4c9   : > { %1936 = vmatpush3.msra.mxu1 %v2712_v28 }
 0x4ca   : > { %1937 = vmatprep.subr.mxu1 %v2397_v41 }
 0x4cb   : > { %1938 = vmatpush3.msra.mxu1 %v2709_v27 }
 0x4cc   : > { %1939 = vmatprep.subr.mxu1 %v2397_v41 }
 0x4cd   : > { %1940 = vmatpush3.msra.mxu1 %v2706_v26 }
 0x4ce   : > { %1941 = vmatprep.subr.mxu1 %v2397_v41 }
 0x4cf   : > { %1942 = vmatpush3.msra.mxu1 %v2703_v25 }
 0x4d0   : > { %1943 = vmatprep.subr.mxu1 %v2397_v41 }
 0x4d1   : > { %1944 = vmatpush3.msra.mxu1 %v2700_v24 }
 0x4d2   : > { %1945 = vmatprep.subr.mxu1 %v2397_v41 }
 0x4d3   : > { %1946 = vmatpush3.msra.mxu1 %v2697_v23 }
 0x4d4   : > { %1947 = vmatprep.subr.mxu1 %v2397_v41 }
 0x4d5   : > { %1948 = vmatpush3.msra.mxu1 %v2694_v22 }
 0x4d6   : > { %1949 = vmatprep.subr.mxu1 %v2397_v41 }
 0x4d7   : > { %1950 = vmatpush3.msra.mxu1 %v2691_v21 }
 0x4d8   : > { %1951 = vmatprep.subr.mxu1 %v2397_v41 }
 0x4d9   : > { %1952 = vmatpush3.msra.mxu1 %v2685_v20 }
 0x4da   : > { %1953 = vmatprep.subr.mxu1 %v2397_v41 }
 0x4db   : > { %1954 = vmatpush3.msra.mxu1 %v2682_v19 }
 0x4dc   : > { %1955 = vmatprep.subr.mxu1 %v2397_v41 }
 0x4dd   : > { %1956 = vmatpush3.msra.mxu1 %v2679_v18 }
 0x4de   : > { %1957 = vmatprep.subr.mxu1 %v2397_v41 }
 0x4df   : > { %1958 = vmatpush3.msra.mxu1 %v2676_v17 }
 0x4e0   : > { %1959 = vmatprep.subr.mxu1 %v2397_v41 }
 0x4e1   : > { %1960 = vmatpush3.msra.mxu1 %v2673_v16 }
 0x4e2   : > { %1999 = vmatprep.subr.mxu1 %v2397_v41 }
 0x582   : > { %v926_v58 = vpop.f32.mrf.mxu1 }
 0x583   : > { %v930_v59 = vadd.f32 %v926_v58, %v859_v57 }
 0x584   : > { %v1893_v60 = vpop.f32.mrf.mxu1 }
 0x585   : > { %v931_v61 = vmax.f32 %v930_v59, 0.0 }
 0x587   : > { %932 = vst [vmem:[#allocation2 + $0x10] sm:$0xff] %v931_v61  ;;  %1927 = vmatmul.mubr.f32.vlgmr.msra.gmra.mxu0 %v931_v61 }
 0x588   : > { %1965 = vmatpush3.msra.mxu0 %v2721_v31  ;;  %1996 = vmatprep.mubr.msk.f32.mxu0 %vm2398_vm0, %v2397_v41 }
 0x589   : > { %1966 = vmatprep.subr.mxu0 %v2397_v41 }
 0x58a   : > { %1967 = vmatpush3.msra.mxu0 %v2718_v30 }
 0x58b   : > { %1968 = vmatprep.subr.mxu0 %v2397_v41 }
 0x58c   : > { %1969 = vmatpush3.msra.mxu0 %v2715_v29 }
 0x58d   : > { %1970 = vmatprep.subr.mxu0 %v2397_v41 }
 0x58e   : > { %1971 = vmatpush3.msra.mxu0 %v2712_v28 }
 0x58f   : > { %1972 = vmatprep.subr.mxu0 %v2397_v41 }
 0x590   : > { %1973 = vmatpush3.msra.mxu0 %v2709_v27 }
 0x591   : > { %1974 = vmatprep.subr.mxu0 %v2397_v41 }
 0x592   : > { %1975 = vmatpush3.msra.mxu0 %v2706_v26 }
 0x593   : > { %1976 = vmatprep.subr.mxu0 %v2397_v41 }
 0x594   : > { %1977 = vmatpush3.msra.mxu0 %v2703_v25 }
 0x595   : > { %1978 = vmatprep.subr.mxu0 %v2397_v41 }
 0x596   : > { %1979 = vmatpush3.msra.mxu0 %v2700_v24 }
 0x597   : > { %1980 = vmatprep.subr.mxu0 %v2397_v41 }
 0x598   : > { %1981 = vmatpush3.msra.mxu0 %v2697_v23 }
 0x599   : > { %1982 = vmatprep.subr.mxu0 %v2397_v41 }
 0x59a   : > { %1983 = vmatpush3.msra.mxu0 %v2694_v22 }
 0x59b   : > { %1984 = vmatprep.subr.mxu0 %v2397_v41 }
 0x59c   : > { %1985 = vmatpush3.msra.mxu0 %v2691_v21 }
 0x59d   : > { %1986 = vmatprep.subr.mxu0 %v2397_v41 }
 0x59e   : > { %1987 = vmatpush3.msra.mxu0 %v2685_v20 }
 0x59f   : > { %1988 = vmatprep.subr.mxu0 %v2397_v41 }
 0x5a0   : > { %1989 = vmatpush3.msra.mxu0 %v2682_v19 }
 0x5a1   : > { %1990 = vmatprep.subr.mxu0 %v2397_v41 }
 0x5a2   : > { %1991 = vmatpush3.msra.mxu0 %v2679_v18 }
 0x5a3   : > { %1992 = vmatprep.subr.mxu0 %v2397_v41 }
 0x5a4   : > { %1993 = vmatpush3.msra.mxu0 %v2676_v17 }
 0x5a5   : > { %1994 = vmatprep.subr.mxu0 %v2397_v41 }
 0x5a6   : > { %1995 = vmatpush3.msra.mxu0 %v2673_v16 }
 0x647   : > { %v1001_v63 = vpop.f32.mrf.mxu0 }
 0x648   : > { %v1005_v3 = vadd.f32 %v1001_v63, %v934_v62 }
 0x649   : > { %v1928_v2 = vpop.f32.mrf.mxu0 }
 0x64a   : > { %v1006_v4 = vmax.f32 %v1005_v3, 0.0 }
 0x64c   : > { %1007 = vst [vmem:[#allocation2 + $0x8] sm:$0xff] %v1006_v4  ;;  %1962 = vmatmul.mubr.f32.vlgmr.msra.gmra.mxu1 %v1006_v4 }
 0x64d   : > { %2000 = vmatpush3.msra.mxu1 %v2721_v31  ;;  %2031 = vmatprep.mubr.msk.f32.mxu1 %vm2398_vm0, %v2397_v41 }
 0x64e   : > { %2001 = vmatprep.subr.mxu1 %v2397_v41 }
 0x64f   : > { %2002 = vmatpush3.msra.mxu1 %v2718_v30 }
 0x650   : > { %2003 = vmatprep.subr.mxu1 %v2397_v41 }
 0x651   : > { %2004 = vmatpush3.msra.mxu1 %v2715_v29 }
 0x652   : > { %2005 = vmatprep.subr.mxu1 %v2397_v41 }
 0x653   : > { %2006 = vmatpush3.msra.mxu1 %v2712_v28  ;;  %v1159_v28 = vld [vmem:[#allocation2 + $0x38] sm:$0xff] }
 0x654   : > { %2007 = vmatprep.subr.mxu1 %v2397_v41 }
 0x655   : > { %2008 = vmatpush3.msra.mxu1 %v2709_v27 }
 0x656   : > { %2009 = vmatprep.subr.mxu1 %v2397_v41 }
 0x657   : > { %2010 = vmatpush3.msra.mxu1 %v2706_v26 }
 0x658   : > { %2011 = vmatprep.subr.mxu1 %v2397_v41 }
 0x659   : > { %2012 = vmatpush3.msra.mxu1 %v2703_v25 }
 0x65a   : > { %2013 = vmatprep.subr.mxu1 %v2397_v41 }
 0x65b   : > { %2014 = vmatpush3.msra.mxu1 %v2700_v24 }
 0x65c   : > { %2015 = vmatprep.subr.mxu1 %v2397_v41 }
 0x65d   : > { %2016 = vmatpush3.msra.mxu1 %v2697_v23 }
 0x65e   : > { %2017 = vmatprep.subr.mxu1 %v2397_v41 }
 0x65f   : > { %2018 = vmatpush3.msra.mxu1 %v2694_v22 }
 0x660   : > { %2019 = vmatprep.subr.mxu1 %v2397_v41 }
 0x661   : > { %2020 = vmatpush3.msra.mxu1 %v2691_v21  ;;  %v1009_v21 = vld [vmem:[#allocation2 + $0x20] sm:$0xff] }
 0x662   : > { %2021 = vmatprep.subr.mxu1 %v2397_v41 }
 0x663   : > { %2022 = vmatpush3.msra.mxu1 %v2685_v20 }
 0x664   : > { %2023 = vmatprep.subr.mxu1 %v2397_v41 }
 0x665   : > { %2024 = vmatpush3.msra.mxu1 %v2682_v19  ;;  %v1084_v19 = vld [vmem:[#allocation2 + $0x28] sm:$0xff] }
 0x666   : > { %2025 = vmatprep.subr.mxu1 %v2397_v41 }
 0x667   : > { %2026 = vmatpush3.msra.mxu1 %v2679_v18 }
 0x668   : > { %2027 = vmatprep.subr.mxu1 %v2397_v41 }
 0x669   : > { %2028 = vmatpush3.msra.mxu1 %v2676_v17 }
 0x66a   : > { %2029 = vmatprep.subr.mxu1 %v2397_v41 }
 0x66b   : > { %2030 = vmatpush3.msra.mxu1 %v2673_v16 }
 0x70c   : > { %v1076_v22 = vpop.f32.mrf.mxu1 }
 0x70d   : > { %v1080_v23 = vadd.f32 %v1076_v22, %v1009_v21 }
 0x70e   : > { %v1963_v20 = vpop.f32.mrf.mxu1 }
 0x70f   : > { %v1081_v24 = vmax.f32 %v1080_v23, 0.0 }
 0x711   : > { %1082 = vst [vmem:[#allocation2 + $0x20] sm:$0xff] %v1081_v24  ;;  %1997 = vmatmul.mubr.f32.vlgmr.msra.gmra.mxu0 %v1081_v24 }
 0x7d1   : > { %v1151_v25 = vpop.f32.mrf.mxu0 }
 0x7d2   : > { %v1155_v26 = vadd.f32 %v1151_v25, %v1084_v19 }
 0x7d3   : > { %v1998_v27 = vpop.f32.mrf.mxu0 }
 0x7d4   : > { %v1156_v18 = vmax.f32 %v1155_v26, 0.0 }
 0x7d6   : > { %1157 = vst [vmem:[#allocation2 + $0x28] sm:$0xff] %v1156_v18  ;;  %2032 = vmatmul.mubr.f32.vlgmr.msra.gmra.mxu1 %v1156_v18 }
 0x896   : > { %v1226_v17 = vpop.f32.mrf.mxu1 }
 0x897   : > { %v1230_v29 = vadd.f32 %v1226_v17, %v1159_v28  ;;  %1236 = sbr.rel (%p1457_p4) target bundleno = 2433 (0x981), region = 72 }
 0x898   : > { %v2033_v30 = vpop.f32.mrf.mxu1 }
 0x899   : > { %v1231_v31 = vmax.f32 %v1230_v29, 0.0 }
 0x89b   : > { %1232 = vst [vmem:[#allocation2 + $0x38] sm:$0xff] %v1231_v31 }
 0x89c   : > { %v1252_v16 = vld [vmem:[#allocation9 + $0x78] sm:$0xff]  ;;  %v2399_v1 = vmov 0.0   ;;  %v1251_v5 = vld [vmem:[#allocation9 + $0x70] sm:$0xff]  ;;  %vm2400_vm1 = vmmov 0   ;;  %v1250_v6 = vld [vmem:[#allocation9 + $0x68] sm:$0xff] }
 0x89d   : > { %2034 = vmatprep.subr.mxu0 %v2399_v1  ;;  %2066 = vmatprep.mubr.msk.f32.mxu0 %vm2400_vm1, %v2399_v1  ;;  %v1249_v7 = vld [vmem:[#allocation9 + $0x60] sm:$0xff]  ;;  %v1248_v8 = vld [vmem:[#allocation9 + $0x58] sm:$0xff]  ;;  %v1247_v9 = vld [vmem:[#allocation9 + $0x50] sm:$0xff] }
 0x89e   : > { %2035 = vmatpush3.msra.mxu0 %v1252_v16  ;;  %v1246_v10 = vld [vmem:[#allocation9 + $0x48] sm:$0xff]  ;;  %v1245_v11 = vld [vmem:[#allocation9 + $0x40] sm:$0xff]  ;;  %v1244_v0 = vld [vmem:[#allocation9 + $0x38] sm:$0xff] }
 0x89f   : > { %2036 = vmatprep.subr.mxu0 %v2399_v1  ;;  %v1243_v12 = vld [vmem:[#allocation9 + $0x30] sm:$0xff]  ;;  %v1242_v13 = vld [vmem:[#allocation9 + $0x28] sm:$0xff]  ;;  %v1241_v14 = vld [vmem:[#allocation9 + $0x20] sm:$0xff] }
 0x8a0   : > { %2037 = vmatpush3.msra.mxu0 %v1251_v5  ;;  %v1240_v15 = vld [vmem:[#allocation9 + $0x18] sm:$0xff]  ;;  %v1239_v33 = vld [vmem:[#allocation9 + $0x10] sm:$0xff]  ;;  %v1238_v34 = vld [vmem:[#allocation9 + $0x8] sm:$0xff] }
 0x8a1   : > { %2038 = vmatprep.subr.mxu0 %v2399_v1  ;;  %v1237_v35 = vld [vmem:[#allocation9] sm:$0xff] }
 0x8a2   : > { %2039 = vmatpush3.msra.mxu0 %v1250_v6  ;;  %v1458_v36 = vld [vmem:[%s3165_s5] ss:$0 sm:$0xff] }
 0x8a3   : > { %2040 = vmatprep.subr.mxu0 %v2399_v1 }
 0x8a4   : > { %2041 = vmatpush3.msra.mxu0 %v1249_v7 }
 0x8a5   : > { %2042 = vmatprep.subr.mxu0 %v2399_v1 }
 0x8a6   : > { %2043 = vmatpush3.msra.mxu0 %v1248_v8 }
 0x8a7   : > { %2044 = vmatprep.subr.mxu0 %v2399_v1 }
 0x8a8   : > { %2045 = vmatpush3.msra.mxu0 %v1247_v9 }
 0x8a9   : > { %2046 = vmatprep.subr.mxu0 %v2399_v1 }
 0x8aa   : > { %2047 = vmatpush3.msra.mxu0 %v1246_v10 }
 0x8ab   : > { %2048 = vmatprep.subr.mxu0 %v2399_v1 }
 0x8ac   : > { %2049 = vmatpush3.msra.mxu0 %v1245_v11 }
 0x8ad   : > { %2050 = vmatprep.subr.mxu0 %v2399_v1 }
 0x8ae   : > { %2051 = vmatpush3.msra.mxu0 %v1244_v0 }
 0x8af   : > { %2052 = vmatprep.subr.mxu0 %v2399_v1 }
 0x8b0   : > { %2053 = vmatpush3.msra.mxu0 %v1243_v12 }
 0x8b1   : > { %2054 = vmatprep.subr.mxu0 %v2399_v1 }
 0x8b2   : > { %2055 = vmatpush3.msra.mxu0 %v1242_v13 }
 0x8b3   : > { %2056 = vmatprep.subr.mxu0 %v2399_v1 }
 0x8b4   : > { %2057 = vmatpush3.msra.mxu0 %v1241_v14 }
 0x8b5   : > { %2058 = vmatprep.subr.mxu0 %v2399_v1 }
 0x8b6   : > { %2059 = vmatpush3.msra.mxu0 %v1240_v15 }
 0x8b7   : > { %2060 = vmatprep.subr.mxu0 %v2399_v1 }
 0x8b8   : > { %2061 = vmatpush3.msra.mxu0 %v1239_v33 }
 0x8b9   : > { %2062 = vmatprep.subr.mxu0 %v2399_v1 }
 0x8ba   : > { %2063 = vmatpush3.msra.mxu0 %v1238_v34 }
 0x8bb   : > { %2064 = vmatprep.subr.mxu0 %v2399_v1 }
 0x8bc   : > { %2065 = vmatpush3.msra.mxu0 %v1237_v35 }
 0x8bd   : > { %2067 = vmatmul.mubr.f32.vlgmr.msra.gmra.mxu0 %v1231_v31 }
 0x97d   : > { %v1326_v37 = vpop.f32.mrf.mxu0 }
 0x97e   : > { %v1327_v38 = vadd.f32 %v1458_v36, %v1326_v37 }
 0x97f   : > { %v2068_v39 = vpop.f32.mrf.mxu0 }
 0x980   : > { %1330 = vst [vmem:[#allocation11] sm:$0xff] %v1327_v38 }
 0x981 PF: > { %p2168_p6 = scmp.eq.s32.totalorder %s2528_s26, 1  ;;  %s2401_s9 = smov [#allocation11]  }
 0x982   : > { %s1338_s29 = sshll.u32 %s2401_s9, 4  ;;  %s1339_s29 = int_to_ptr.vmem [resolvable:$true] %s1338_s29 }
 0x983   : > { %s2319_s14 = scalar_lea.vmem %s1339_s29, 128  ;;  %p2326_p0 = scmp.lt.s32.totalorder %s1339_s29, %s1339_s29 }
 0x984   : > { %p2320_p9 = scmp.ne.s32.totalorder %s1339_s29, %s2319_s14  ;;  %p2327_p7 = scmp.lt.s32.totalorder %s2319_s14, %s2319_s14 }
 0x986   : > { %p2321_p10 = pnand %p2320_p9, %p2168_p6  ;;  %p2328_p1 = por %p2327_p7, %p2326_p0 }
 0x988   : > { %p2322_p13 = pneg %p2321_p10 }
 0x98a   : > { %p2329_p8 = pnand %p2328_p1, %p2322_p13 }
 0x98c   : > { %2332 = shalt.err (!%p2329_p8)
}
 0x98d   : > { %2146 = dma.vmem_to_hbm [thread:$0]  (%p2168_p6), %s1339_s29, 128, %s3166_s6, [#allocation5]  }
 0x98e   : > { %2372 = dma.done.wait (%p2168_p6), [#allocation5], 128  }
 0x98f   : > { %2374 = vsyncadd (%p2168_p6), [#allocation5], 4294967168 }
 0x990 PF: > { %p19_p3 = scmp.ge.s32.totalorder %s2458_s25, 4   ;;  %s3181_s21 = smov %s2381_s22 }
 0x991   : > { %s3182_s22 = smov %s2385_s23  ;;  %s3183_s23 = smov %s2467_s28 }
 0x992   : > { %s3184_s24 = smov %s2458_s25  ;;  %21 = sbr.rel (!%p19_p3) target bundleno = 6 (0x6), region = 123 }
 0x997   :  { %1351 = vsyncpa [#allocation4], 1 }
 0x998   :  { %1353 = vsyncpa [#allocation4 + $0x1], 1 }
 0x999   :  { %1354 = vsyncpa [#allocation7], 1 }
 0x99a   :  { %1356 = vsyncpa [#allocation7 + $0x1], 1 }
 0x99b   :  { %1357 = vsyncpa [#allocation10], 1 }
 0x99c   :  { %1358 = vsyncpa [#allocation5], 1 }
 0x99d   :  { %1360 = vsyncpa [#allocation5 + $0x1], 1 }

</bundles_post_ra>
